<compile_context>
chip_gen: v7x
topology: tpu7x:2x2x1
jax: 0.10.0
libtpu: 0.0.40
codegen_flags: <defaults>
</compile_context>

<pallas_src>
import functools

import jax
import jax.numpy as jnp
import numpy as np
from jax.experimental import pallas as pl
from jax.experimental.pallas import tpu as pltpu


# ----------------------------------------------------------------------------
# Fused BasicBlock kernel (one batch element per grid step, all in VMEM)
# ----------------------------------------------------------------------------
def _basic_block_kernel(x_ref, w1_ref, s1_ref, b1_ref, w2_ref, s2_ref, b2_ref,
                        *rest, stride, ho, wo, wrow1, has_projection):
    if has_projection:
        wsc_ref, ssc_ref, bsc_ref, xs_ref, o_ref, y1raw_ref, y1pad_ref = rest
    else:
        o_ref, y1raw_ref, y1pad_ref = rest

    wrow2 = wo + 2                 # row width of the conv2 / output layout
    r1 = ho * wrow1                # conv1 output rows (incl. junk columns)
    r2 = ho * wrow2                # conv2 output rows (incl. junk columns)
    cout = w1_ref.shape[-1]
    f32 = jnp.float32

    # ---- conv1: 3x3 / stride / pad=1 as 9 shifted-slab matmuls, BN1 + ReLU ----
    acc1 = jnp.zeros((r1, cout), f32)
    for ki in range(3):
        for kj in range(3):
            if stride == 1:
                tap = x_ref[0, pl.ds(ki * wrow1 + kj, r1), :]
            else:  # stride 2: input is 2x2 phase-decomposed -> phase + offset
                p = (ki % 2) * 2 + (kj % 2)
                tap = x_ref[0, p, pl.ds((ki // 2) * wrow1 + (kj // 2), r1), :]
            acc1 += jnp.dot(tap, w1_ref[ki * 3 + kj],
                            preferred_element_type=f32)
    y1raw_ref[...] = jnp.maximum(acc1 * s1_ref[...] + b1_ref[...], 0.0
                                 ).astype(y1raw_ref.dtype)

    # ---- re-pad y1 with a zero ring inside VMEM (never leaves the chip) ----
    y1pad_ref[...] = jnp.zeros_like(y1pad_ref)
    for i in range(ho):
        y1pad_ref[pl.ds((i + 1) * wrow2 + 1, wo), :] = \
            y1raw_ref[pl.ds(i * wrow1, wo), :]

    # ---- conv2: 3x3 / stride 1 / pad=1, BN2 (f32 affine) ----
    acc2 = jnp.zeros((r2, cout), f32)
    for ki in range(3):
        for kj in range(3):
            tap = y1pad_ref[pl.ds(ki * wrow2 + kj, r2), :]
            acc2 += jnp.dot(tap, w2_ref[ki * 3 + kj],
                            preferred_element_type=f32)
    out = acc2 * s2_ref[...] + b2_ref[...]

    # ---- shortcut: 1x1 projection + BN, or identity residual, then ReLU ----
    if has_projection:
        sc = jnp.dot(xs_ref[0], wsc_ref[...], preferred_element_type=f32)
        out = out + sc * ssc_ref[...] + bsc_ref[...]
    else:
        # identity shortcut read straight from the padded input slab
        out = out + x_ref[0, pl.ds(wrow1 + 1, r2), :].astype(f32)

    o_ref[0] = jnp.maximum(out, 0.0).astype(o_ref.dtype)


def fold_bn(bn, eps=1e-5):
    scale = bn["gamma"] / jnp.sqrt(bn["var"] + eps)
    bias = bn["beta"] - bn["mean"] * scale
    return scale, bias


# ----------------------------------------------------------------------------
# Wrapper: layout prep (pad / flatten / phase-split), specs, pallas_call
# ----------------------------------------------------------------------------
def basic_block_forward(x_nchw, params, stride):
    N, Cin, H, W = x_nchw.shape
    Cout = params["w1"].shape[-1]
    has_projection = (stride != 1) or (Cin != Cout)

    Ho = (H + 2 - 3) // stride + 1
    Wo = (W + 2 - 3) // stride + 1
    Wrow2 = Wo + 2
    R2 = Ho * Wrow2

    x = jnp.transpose(x_nchw, (0, 2, 3, 1)).astype(jnp.bfloat16)     # NHWC bf16
    x_pad = jnp.pad(x, ((0, 0), (1, 1), (1, 1), (0, 0)))             # (N,H+2,W+2,Cin)

    if stride == 1:
        Wrow1 = W + 2
        x_in = x_pad.reshape(N, (H + 2) * (W + 2), Cin)
        x_in = jnp.pad(x_in, ((0, 0), (0, 8), (0, 0)))               # over-read guard
        x_spec = pl.BlockSpec((1,) + x_in.shape[1:], lambda n: (n, 0, 0))
    elif stride == 2:
        Hp = H + 2 + (H % 2)                                         # even spatial
        Wp = W + 2 + (W % 2)
        Wrow1 = Wp // 2
        xe = jnp.pad(x_pad, ((0, 0), (0, Hp - (H + 2)), (0, Wp - (W + 2)), (0, 0)))
        x_ph = xe.reshape(N, Hp // 2, 2, Wp // 2, 2, Cin).transpose(0, 2, 4, 1, 3, 5)
        x_ph = x_ph.reshape(N, 4, (Hp // 2) * Wrow1, Cin)            # phase p=2*pi+pj
        x_in = jnp.pad(x_ph, ((0, 0), (0, 0), (0, 8), (0, 0)))       # over-read guard
        x_spec = pl.BlockSpec((1,) + x_in.shape[1:], lambda n: (n, 0, 0, 0))
    else:
        raise NotImplementedError("BasicBlock only uses stride 1 or 2")

    R1 = Ho * Wrow1
    Rpad = (Ho + 2) * Wrow2 + 8

    # Weight / BN prep (once per call; constants in a real network).
    w1 = params["w1"].reshape(9, Cin, Cout).astype(jnp.bfloat16)
    w2 = params["w2"].reshape(9, Cout, Cout).astype(jnp.bfloat16)
    aff = lambda v: v.reshape(1, Cout).astype(jnp.float32)
    s1, b1 = fold_bn(params["bn1"])
    s2, b2 = fold_bn(params["bn2"])

    args = [x_in, w1, aff(s1), aff(b1), w2, aff(s2), aff(b2)]
    chan_spec = pl.BlockSpec((1, Cout), lambda n: (0, 0))
    in_specs = [x_spec,
                pl.BlockSpec((9, Cin, Cout), lambda n: (0, 0, 0)),
                chan_spec, chan_spec,
                pl.BlockSpec((9, Cout, Cout), lambda n: (0, 0, 0)),
                chan_spec, chan_spec]

    if has_projection:
        ssc, bsc = fold_bn(params["bn_sc"])
        xs = x[:, ::stride, ::stride, :]                             # (N,Ho,Wo,Cin)
        xs = jnp.pad(xs, ((0, 0), (0, 0), (0, Wrow2 - Wo), (0, 0)))  # match layout
        xs = xs.reshape(N, R2, Cin)
        args += [params["w_sc"].reshape(Cin, Cout).astype(jnp.bfloat16),
                 aff(ssc), aff(bsc), xs]
        in_specs += [pl.BlockSpec((Cin, Cout), lambda n: (0, 0)),
                     chan_spec, chan_spec,
                     pl.BlockSpec((1, R2, Cin), lambda n: (n, 0, 0))]

    kernel = functools.partial(
        _basic_block_kernel, stride=stride, ho=Ho, wo=Wo, wrow1=Wrow1,
        has_projection=has_projection)

    flops = 2 * N * Ho * Wo * Cout * (9 * Cin + 9 * Cout
                                      + (Cin if has_projection else 0))
    bytes_accessed = int(x_in.size * 2 + w1.size * 2 + w2.size * 2
                         + N * R2 * (Cout + (Cin if has_projection else 0)) * 2)

    out = pl.pallas_call(
        kernel,
        out_shape=jax.ShapeDtypeStruct((N, R2, Cout), jnp.bfloat16),
        grid=(N,),
        in_specs=in_specs,
        out_specs=pl.BlockSpec((1, R2, Cout), lambda n: (n, 0, 0)),
        scratch_shapes=[pltpu.VMEM((R1, Cout), jnp.bfloat16),
                        pltpu.VMEM((Rpad, Cout), jnp.bfloat16)],
        compiler_params=pltpu.CompilerParams(
            dimension_semantics=("parallel",),        # batch axis -> 2 TCs on v7x
            vmem_limit_bytes=32 * 1024 * 1024),
        cost_estimate=pl.CostEstimate(flops=flops, transcendentals=0,
                                      bytes_accessed=bytes_accessed),
    )(*args)

    out_img = out.reshape(N, Ho, Wrow2, Cout)[:, :, :Wo, :]          # drop junk cols
    return jnp.transpose(out_img, (0, 3, 1, 2)).astype(jnp.float32)  # NCHW f32


# ----------------------------------------------------------------------------
# Pure-JAX reference (lax.conv, f32) used only to sanity-check the Pallas path
# ----------------------------------------------------------------------------
def reference_forward(x_nchw, params, stride):
    x = jnp.transpose(x_nchw, (0, 2, 3, 1))

    def conv(inp, w_hwio, s, pad):
        dn = jax.lax.conv_dimension_numbers(inp.shape, w_hwio.shape,
                                            ("NHWC", "HWIO", "NHWC"))
        return jax.lax.conv_general_dilated(
            inp, w_hwio, (s, s), pad, dimension_numbers=dn,
            precision=jax.lax.Precision.HIGHEST)

    def bn(y, p):
        scale, bias = fold_bn(p)
        return y * scale + bias

    Cin = x.shape[-1]
    Cout = params["w1"].shape[-1]
    y = jnp.maximum(bn(conv(x, params["w1"], stride, ((1, 1), (1, 1))),
                       params["bn1"]), 0.0)
    y = bn(conv(y, params["w2"], 1, ((1, 1), (1, 1))), params["bn2"])
    if stride != 1 or Cin != Cout:
        sc = bn(conv(x, params["w_sc"].reshape(1, 1, Cin, Cout), stride,
                     ((0, 0), (0, 0))), params["bn_sc"])
    else:
        sc = x
    out = jnp.maximum(y + sc, 0.0)
    return jnp.transpose(out, (0, 3, 1, 2))


# ----------------------------------------------------------------------------
# Deterministic parameter construction (shapes follow BasicBlock.__init__)
# ----------------------------------------------------------------------------
def make_params(key, in_channels, out_channels):
    ks = jax.random.split(key, 6)

    def bn_params(k, c):
        k1, k2, k3, k4 = jax.random.split(k, 4)
        return {
            "gamma": jax.random.uniform(k1, (c,), minval=0.5, maxval=1.5),
            "beta": jax.random.normal(k2, (c,)) * 0.1,
            "mean": jax.random.normal(k3, (c,)) * 0.1,
            "var": jax.random.uniform(k4, (c,), minval=0.5, maxval=1.5),
        }

    return {
        "w1": jax.random.normal(ks[0], (3, 3, in_channels, out_channels)) * 0.1,
        "bn1": bn_params(ks[1], out_channels),
        "w2": jax.random.normal(ks[2], (3, 3, out_channels, out_channels)) * 0.1,
        "bn2": bn_params(ks[3], out_channels),
        "w_sc": jax.random.normal(ks[4], (in_channels, out_channels)) * 0.1,
        "bn_sc": bn_params(ks[5], out_channels),
    }


if __name__ == "__main__":
    key = jax.random.PRNGKey(0)
    k_x, k_p, k_x2, k_p2, k_x3, k_p3 = jax.random.split(key, 6)

    fwd = jax.jit(basic_block_forward, static_argnums=2)

    # --- projection shortcut path (stride=2, Cin != Cout) ---
    x = jax.random.normal(k_x, (2, 4, 16, 16), dtype=jnp.float32)
    params = make_params(k_p, 4, 8)
    out = jax.block_until_ready(fwd(x, params, 2))
    ref = jax.block_until_ready(reference_forward(x, params, 2))
    assert out.shape == (2, 8, 8, 8)
    np.testing.assert_allclose(np.asarray(out), np.asarray(ref),
                               rtol=3e-2, atol=3e-2)

    # --- identity shortcut path (stride=1, Cin == Cout) ---
    x2 = jax.random.normal(k_x2, (2, 8, 16, 16), dtype=jnp.float32)
    params2 = make_params(k_p2, 8, 8)
    out2 = jax.block_until_ready(fwd(x2, params2, 1))
    ref2 = jax.block_until_ready(reference_forward(x2, params2, 1))
    assert out2.shape == (2, 8, 16, 16)
    np.testing.assert_allclose(np.asarray(out2), np.asarray(ref2),
                               rtol=3e-2, atol=3e-2)

    # --- projection shortcut path (stride=1, Cin != Cout) ---
    x3 = jax.random.normal(k_x3, (2, 4, 8, 8), dtype=jnp.float32)
    params3 = make_params(k_p3, 4, 8)
    out3 = jax.block_until_ready(fwd(x3, params3, 1))
    ref3 = jax.block_until_ready(reference_forward(x3, params3, 1))
    assert out3.shape == (2, 8, 8, 8)
    np.testing.assert_allclose(np.asarray(out3), np.asarray(ref3),
                               rtol=3e-2, atol=3e-2)

    print("KERNEL_OK")
</pallas_src>

<mosaic_0001>
module attributes {stable_mosaic.version = 11 : i64} {
  func.func @_basic_block_kernel(%arg0: i32, %arg1: memref<1x4x89x4xbf16, #tpu.memory_space<vmem>>, %arg2: memref<9x4x8xbf16, #tpu.memory_space<vmem>>, %arg3: memref<1x8xf32, #tpu.memory_space<vmem>>, %arg4: memref<1x8xf32, #tpu.memory_space<vmem>>, %arg5: memref<9x8x8xbf16, #tpu.memory_space<vmem>>, %arg6: memref<1x8xf32, #tpu.memory_space<vmem>>, %arg7: memref<1x8xf32, #tpu.memory_space<vmem>>, %arg8: memref<4x8xbf16, #tpu.memory_space<vmem>>, %arg9: memref<1x8xf32, #tpu.memory_space<vmem>>, %arg10: memref<1x8xf32, #tpu.memory_space<vmem>>, %arg11: memref<1x80x4xbf16, #tpu.memory_space<vmem>>, %arg12: memref<1x80x8xbf16, #tpu.memory_space<vmem>>, %arg13: memref<72x8xbf16, #tpu.memory_space<vmem>>, %arg14: memref<108x8xbf16, #tpu.memory_space<vmem>>) attributes {dimension_semantics = [#tpu.dimension_semantics<parallel>], iteration_bounds = array<i64: 2>, scalar_prefetch = 0 : i64, scratch_operands = 2 : i64, tpu.core_type = #tpu.core_type<tc>, window_params = [{transform_indices = @transform_0, window_bounds = array<i64: 1, 4, 89, 4>}, {pipeline_mode = #tpu.pipeline_mode<synchronous>, transform_indices = @transform_1, window_bounds = array<i64: 9, 4, 8>}, {pipeline_mode = #tpu.pipeline_mode<synchronous>, transform_indices = @transform_2, window_bounds = array<i64: 1, 8>}, {pipeline_mode = #tpu.pipeline_mode<synchronous>, transform_indices = @transform_3, window_bounds = array<i64: 1, 8>}, {pipeline_mode = #tpu.pipeline_mode<synchronous>, transform_indices = @transform_4, window_bounds = array<i64: 9, 8, 8>}, {pipeline_mode = #tpu.pipeline_mode<synchronous>, transform_indices = @transform_5, window_bounds = array<i64: 1, 8>}, {pipeline_mode = #tpu.pipeline_mode<synchronous>, transform_indices = @transform_6, window_bounds = array<i64: 1, 8>}, {pipeline_mode = #tpu.pipeline_mode<synchronous>, transform_indices = @transform_7, window_bounds = array<i64: 4, 8>}, {pipeline_mode = #tpu.pipeline_mode<synchronous>, transform_indices = @transform_8, window_bounds = array<i64: 1, 8>}, {pipeline_mode = #tpu.pipeline_mode<synchronous>, transform_indices = @transform_9, window_bounds = array<i64: 1, 8>}, {transform_indices = @transform_10, window_bounds = array<i64: 1, 80, 4>}, {transform_indices = @transform_11, window_bounds = array<i64: 1, 80, 8>}]} {
    %cst = arith.constant 0.000000e+00 : f32
    %0 = vector.broadcast %cst : f32 to vector<72x8xf32>
    %c0 = arith.constant 0 : index
    %c0_0 = arith.constant 0 : index
    %c0_1 = arith.constant 0 : index
    %c0_2 = arith.constant 0 : index
    %1 = vector.load %arg1[%c0, %c0_0, %c0_1, %c0_2] : memref<1x4x89x4xbf16, #tpu.memory_space<vmem>>, vector<1x1x72x4xbf16>
    %2 = vector.shape_cast %1 : vector<1x1x72x4xbf16> to vector<72x4xbf16>
    %c0_3 = arith.constant 0 : index
    %c0_4 = arith.constant 0 : index
    %c0_5 = arith.constant 0 : index
    %3 = vector.load %arg2[%c0_3, %c0_4, %c0_5] : memref<9x4x8xbf16, #tpu.memory_space<vmem>>, vector<1x4x8xbf16>
    %4 = vector.shape_cast %3 : vector<1x4x8xbf16> to vector<4x8xbf16>
    %cst_6 = arith.constant dense<0.000000e+00> : vector<72x8xf32>
    %5 = tpu.matmul %2, %4, %cst_6 {dimension_numbers = #tpu.dot_dimension_numbers<[1], [0], [0], [1], [0, 0, 1, 1], [], []>} : vector<72x4xbf16>, vector<4x8xbf16>, vector<72x8xf32> -> vector<72x8xf32>
    %6 = arith.addf %0, %5 : vector<72x8xf32>
    %c0_7 = arith.constant 0 : index
    %c1 = arith.constant 1 : index
    %c0_8 = arith.constant 0 : index
    %c0_9 = arith.constant 0 : index
    %7 = vector.load %arg1[%c0_7, %c1, %c0_8, %c0_9] : memref<1x4x89x4xbf16, #tpu.memory_space<vmem>>, vector<1x1x72x4xbf16>
    %8 = vector.shape_cast %7 : vector<1x1x72x4xbf16> to vector<72x4xbf16>
    %c1_10 = arith.constant 1 : index
    %c0_11 = arith.constant 0 : index
    %c0_12 = arith.constant 0 : index
    %9 = vector.load %arg2[%c1_10, %c0_11, %c0_12] : memref<9x4x8xbf16, #tpu.memory_space<vmem>>, vector<1x4x8xbf16>
    %10 = vector.shape_cast %9 : vector<1x4x8xbf16> to vector<4x8xbf16>
    %cst_13 = arith.constant dense<0.000000e+00> : vector<72x8xf32>
    %11 = tpu.matmul %8, %10, %cst_13 {dimension_numbers = #tpu.dot_dimension_numbers<[1], [0], [0], [1], [0, 0, 1, 1], [], []>} : vector<72x4xbf16>, vector<4x8xbf16>, vector<72x8xf32> -> vector<72x8xf32>
    %12 = arith.addf %6, %11 : vector<72x8xf32>
    %c0_14 = arith.constant 0 : index
    %c0_15 = arith.constant 0 : index
    %c1_16 = arith.constant 1 : index
    %c0_17 = arith.constant 0 : index
    %13 = vector.load %arg1[%c0_14, %c0_15, %c1_16, %c0_17] : memref<1x4x89x4xbf16, #tpu.memory_space<vmem>>, vector<1x1x72x4xbf16>
    %14 = vector.shape_cast %13 : vector<1x1x72x4xbf16> to vector<72x4xbf16>
    %c2 = arith.constant 2 : index
    %c0_18 = arith.constant 0 : index
    %c0_19 = arith.constant 0 : index
    %15 = vector.load %arg2[%c2, %c0_18, %c0_19] : memref<9x4x8xbf16, #tpu.memory_space<vmem>>, vector<1x4x8xbf16>
    %16 = vector.shape_cast %15 : vector<1x4x8xbf16> to vector<4x8xbf16>
    %cst_20 = arith.constant dense<0.000000e+00> : vector<72x8xf32>
    %17 = tpu.matmul %14, %16, %cst_20 {dimension_numbers = #tpu.dot_dimension_numbers<[1], [0], [0], [1], [0, 0, 1, 1], [], []>} : vector<72x4xbf16>, vector<4x8xbf16>, vector<72x8xf32> -> vector<72x8xf32>
    %18 = arith.addf %12, %17 : vector<72x8xf32>
    %c0_21 = arith.constant 0 : index
    %c2_22 = arith.constant 2 : index
    %c0_23 = arith.constant 0 : index
    %c0_24 = arith.constant 0 : index
    %19 = vector.load %arg1[%c0_21, %c2_22, %c0_23, %c0_24] : memref<1x4x89x4xbf16, #tpu.memory_space<vmem>>, vector<1x1x72x4xbf16>
    %20 = vector.shape_cast %19 : vector<1x1x72x4xbf16> to vector<72x4xbf16>
    %c3 = arith.constant 3 : index
    %c0_25 = arith.constant 0 : index
    %c0_26 = arith.constant 0 : index
    %21 = vector.load %arg2[%c3, %c0_25, %c0_26] : memref<9x4x8xbf16, #tpu.memory_space<vmem>>, vector<1x4x8xbf16>
    %22 = vector.shape_cast %21 : vector<1x4x8xbf16> to vector<4x8xbf16>
    %cst_27 = arith.constant dense<0.000000e+00> : vector<72x8xf32>
    %23 = tpu.matmul %20, %22, %cst_27 {dimension_numbers = #tpu.dot_dimension_numbers<[1], [0], [0], [1], [0, 0, 1, 1], [], []>} : vector<72x4xbf16>, vector<4x8xbf16>, vector<72x8xf32> -> vector<72x8xf32>
    %24 = arith.addf %18, %23 : vector<72x8xf32>
    %c0_28 = arith.constant 0 : index
    %c3_29 = arith.constant 3 : index
    %c0_30 = arith.constant 0 : index
    %c0_31 = arith.constant 0 : index
    %25 = vector.load %arg1[%c0_28, %c3_29, %c0_30, %c0_31] : memref<1x4x89x4xbf16, #tpu.memory_space<vmem>>, vector<1x1x72x4xbf16>
    %26 = vector.shape_cast %25 : vector<1x1x72x4xbf16> to vector<72x4xbf16>
    %c4 = arith.constant 4 : index
    %c0_32 = arith.constant 0 : index
    %c0_33 = arith.constant 0 : index
    %27 = vector.load %arg2[%c4, %c0_32, %c0_33] : memref<9x4x8xbf16, #tpu.memory_space<vmem>>, vector<1x4x8xbf16>
    %28 = vector.shape_cast %27 : vector<1x4x8xbf16> to vector<4x8xbf16>
    %cst_34 = arith.constant dense<0.000000e+00> : vector<72x8xf32>
    %29 = tpu.matmul %26, %28, %cst_34 {dimension_numbers = #tpu.dot_dimension_numbers<[1], [0], [0], [1], [0, 0, 1, 1], [], []>} : vector<72x4xbf16>, vector<4x8xbf16>, vector<72x8xf32> -> vector<72x8xf32>
    %30 = arith.addf %24, %29 : vector<72x8xf32>
    %c0_35 = arith.constant 0 : index
    %c2_36 = arith.constant 2 : index
    %c1_37 = arith.constant 1 : index
    %c0_38 = arith.constant 0 : index
    %31 = vector.load %arg1[%c0_35, %c2_36, %c1_37, %c0_38] : memref<1x4x89x4xbf16, #tpu.memory_space<vmem>>, vector<1x1x72x4xbf16>
    %32 = vector.shape_cast %31 : vector<1x1x72x4xbf16> to vector<72x4xbf16>
    %c5 = arith.constant 5 : index
    %c0_39 = arith.constant 0 : index
    %c0_40 = arith.constant 0 : index
    %33 = vector.load %arg2[%c5, %c0_39, %c0_40] : memref<9x4x8xbf16, #tpu.memory_space<vmem>>, vector<1x4x8xbf16>
    %34 = vector.shape_cast %33 : vector<1x4x8xbf16> to vector<4x8xbf16>
    %cst_41 = arith.constant dense<0.000000e+00> : vector<72x8xf32>
    %35 = tpu.matmul %32, %34, %cst_41 {dimension_numbers = #tpu.dot_dimension_numbers<[1], [0], [0], [1], [0, 0, 1, 1], [], []>} : vector<72x4xbf16>, vector<4x8xbf16>, vector<72x8xf32> -> vector<72x8xf32>
    %36 = arith.addf %30, %35 : vector<72x8xf32>
    %c0_42 = arith.constant 0 : index
    %c0_43 = arith.constant 0 : index
    %c9 = arith.constant 9 : index
    %c0_44 = arith.constant 0 : index
    %37 = vector.load %arg1[%c0_42, %c0_43, %c9, %c0_44] : memref<1x4x89x4xbf16, #tpu.memory_space<vmem>>, vector<1x1x72x4xbf16>
    %38 = vector.shape_cast %37 : vector<1x1x72x4xbf16> to vector<72x4xbf16>
    %c6 = arith.constant 6 : index
    %c0_45 = arith.constant 0 : index
    %c0_46 = arith.constant 0 : index
    %39 = vector.load %arg2[%c6, %c0_45, %c0_46] : memref<9x4x8xbf16, #tpu.memory_space<vmem>>, vector<1x4x8xbf16>
    %40 = vector.shape_cast %39 : vector<1x4x8xbf16> to vector<4x8xbf16>
    %cst_47 = arith.constant dense<0.000000e+00> : vector<72x8xf32>
    %41 = tpu.matmul %38, %40, %cst_47 {dimension_numbers = #tpu.dot_dimension_numbers<[1], [0], [0], [1], [0, 0, 1, 1], [], []>} : vector<72x4xbf16>, vector<4x8xbf16>, vector<72x8xf32> -> vector<72x8xf32>
    %42 = arith.addf %36, %41 : vector<72x8xf32>
    %c0_48 = arith.constant 0 : index
    %c1_49 = arith.constant 1 : index
    %c9_50 = arith.constant 9 : index
    %c0_51 = arith.constant 0 : index
    %43 = vector.load %arg1[%c0_48, %c1_49, %c9_50, %c0_51] : memref<1x4x89x4xbf16, #tpu.memory_space<vmem>>, vector<1x1x72x4xbf16>
    %44 = vector.shape_cast %43 : vector<1x1x72x4xbf16> to vector<72x4xbf16>
    %c7 = arith.constant 7 : index
    %c0_52 = arith.constant 0 : index
    %c0_53 = arith.constant 0 : index
    %45 = vector.load %arg2[%c7, %c0_52, %c0_53] : memref<9x4x8xbf16, #tpu.memory_space<vmem>>, vector<1x4x8xbf16>
    %46 = vector.shape_cast %45 : vector<1x4x8xbf16> to vector<4x8xbf16>
    %cst_54 = arith.constant dense<0.000000e+00> : vector<72x8xf32>
    %47 = tpu.matmul %44, %46, %cst_54 {dimension_numbers = #tpu.dot_dimension_numbers<[1], [0], [0], [1], [0, 0, 1, 1], [], []>} : vector<72x4xbf16>, vector<4x8xbf16>, vector<72x8xf32> -> vector<72x8xf32>
    %48 = arith.addf %42, %47 : vector<72x8xf32>
    %c0_55 = arith.constant 0 : index
    %c0_56 = arith.constant 0 : index
    %c10 = arith.constant 10 : index
    %c0_57 = arith.constant 0 : index
    %49 = vector.load %arg1[%c0_55, %c0_56, %c10, %c0_57] : memref<1x4x89x4xbf16, #tpu.memory_space<vmem>>, vector<1x1x72x4xbf16>
    %50 = vector.shape_cast %49 : vector<1x1x72x4xbf16> to vector<72x4xbf16>
    %c8 = arith.constant 8 : index
    %c0_58 = arith.constant 0 : index
    %c0_59 = arith.constant 0 : index
    %51 = vector.load %arg2[%c8, %c0_58, %c0_59] : memref<9x4x8xbf16, #tpu.memory_space<vmem>>, vector<1x4x8xbf16>
    %52 = vector.shape_cast %51 : vector<1x4x8xbf16> to vector<4x8xbf16>
    %cst_60 = arith.constant dense<0.000000e+00> : vector<72x8xf32>
    %53 = tpu.matmul %50, %52, %cst_60 {dimension_numbers = #tpu.dot_dimension_numbers<[1], [0], [0], [1], [0, 0, 1, 1], [], []>} : vector<72x4xbf16>, vector<4x8xbf16>, vector<72x8xf32> -> vector<72x8xf32>
    %54 = arith.addf %48, %53 : vector<72x8xf32>
    %c0_61 = arith.constant 0 : index
    %c0_62 = arith.constant 0 : index
    %55 = vector.load %arg3[%c0_61, %c0_62] : memref<1x8xf32, #tpu.memory_space<vmem>>, vector<1x8xf32>
    %56 = vector.broadcast %55 : vector<1x8xf32> to vector<72x8xf32>
    %57 = arith.mulf %54, %56 : vector<72x8xf32>
    %c0_63 = arith.constant 0 : index
    %c0_64 = arith.constant 0 : index
    %58 = vector.load %arg4[%c0_63, %c0_64] : memref<1x8xf32, #tpu.memory_space<vmem>>, vector<1x8xf32>
    %59 = vector.broadcast %58 : vector<1x8xf32> to vector<72x8xf32>
    %60 = arith.addf %57, %59 : vector<72x8xf32>
    %cst_65 = arith.constant 0.000000e+00 : f32
    %61 = vector.broadcast %cst_65 : f32 to vector<72x8xf32>
    %62 = arith.maximumf %60, %61 : vector<72x8xf32>
    %63 = arith.truncf %62 : vector<72x8xf32> to vector<72x8xbf16>
    %c0_66 = arith.constant 0 : index
    %c0_67 = arith.constant 0 : index
    %64 = vector.load %arg13[%c0_66, %c0_67] : memref<72x8xbf16, #tpu.memory_space<vmem>>, vector<72x8xbf16>
    tpu.vector_store %arg13[%c0_66, %c0_67], %63 {strides = array<i32>} : memref<72x8xbf16, #tpu.memory_space<vmem>>, vector<72x8xbf16>,
    %cst_68 = arith.constant 0.000000e+00 : bf16
    %65 = vector.broadcast %cst_68 : bf16 to vector<108x8xbf16>
    %c0_69 = arith.constant 0 : index
    %c0_70 = arith.constant 0 : index
    %66 = vector.load %arg14[%c0_69, %c0_70] : memref<108x8xbf16, #tpu.memory_space<vmem>>, vector<108x8xbf16>
    tpu.vector_store %arg14[%c0_69, %c0_70], %65 {strides = array<i32>} : memref<108x8xbf16, #tpu.memory_space<vmem>>, vector<108x8xbf16>,
    %c0_71 = arith.constant 0 : index
    %c0_72 = arith.constant 0 : index
    %67 = vector.load %arg13[%c0_71, %c0_72] : memref<72x8xbf16, #tpu.memory_space<vmem>>, vector<8x8xbf16>
    %c11 = arith.constant 11 : index
    %c0_73 = arith.constant 0 : index
    %68 = vector.load %arg14[%c11, %c0_73] : memref<108x8xbf16, #tpu.memory_space<vmem>>, vector<8x8xbf16>
    tpu.vector_store %arg14[%c11, %c0_73], %67 {strides = array<i32>} : memref<108x8xbf16, #tpu.memory_space<vmem>>, vector<8x8xbf16>,
    %c9_74 = arith.constant 9 : index
    %c0_75 = arith.constant 0 : index
    %69 = vector.load %arg13[%c9_74, %c0_75] : memref<72x8xbf16, #tpu.memory_space<vmem>>, vector<8x8xbf16>
    %c21 = arith.constant 21 : index
    %c0_76 = arith.constant 0 : index
    %70 = vector.load %arg14[%c21, %c0_76] : memref<108x8xbf16, #tpu.memory_space<vmem>>, vector<8x8xbf16>
    tpu.vector_store %arg14[%c21, %c0_76], %69 {strides = array<i32>} : memref<108x8xbf16, #tpu.memory_space<vmem>>, vector<8x8xbf16>,
    %c18 = arith.constant 18 : index
    %c0_77 = arith.constant 0 : index
    %71 = vector.load %arg13[%c18, %c0_77] : memref<72x8xbf16, #tpu.memory_space<vmem>>, vector<8x8xbf16>
    %c31 = arith.constant 31 : index
    %c0_78 = arith.constant 0 : index
    %72 = vector.load %arg14[%c31, %c0_78] : memref<108x8xbf16, #tpu.memory_space<vmem>>, vector<8x8xbf16>
    tpu.vector_store %arg14[%c31, %c0_78], %71 {strides = array<i32>} : memref<108x8xbf16, #tpu.memory_space<vmem>>, vector<8x8xbf16>,
    %c27 = arith.constant 27 : index
    %c0_79 = arith.constant 0 : index
    %73 = vector.load %arg13[%c27, %c0_79] : memref<72x8xbf16, #tpu.memory_space<vmem>>, vector<8x8xbf16>
    %c41 = arith.constant 41 : index
    %c0_80 = arith.constant 0 : index
    %74 = vector.load %arg14[%c41, %c0_80] : memref<108x8xbf16, #tpu.memory_space<vmem>>, vector<8x8xbf16>
    tpu.vector_store %arg14[%c41, %c0_80], %73 {strides = array<i32>} : memref<108x8xbf16, #tpu.memory_space<vmem>>, vector<8x8xbf16>,
    %c36 = arith.constant 36 : index
    %c0_81 = arith.constant 0 : index
    %75 = vector.load %arg13[%c36, %c0_81] : memref<72x8xbf16, #tpu.memory_space<vmem>>, vector<8x8xbf16>
    %c51 = arith.constant 51 : index
    %c0_82 = arith.constant 0 : index
    %76 = vector.load %arg14[%c51, %c0_82] : memref<108x8xbf16, #tpu.memory_space<vmem>>, vector<8x8xbf16>
    tpu.vector_store %arg14[%c51, %c0_82], %75 {strides = array<i32>} : memref<108x8xbf16, #tpu.memory_space<vmem>>, vector<8x8xbf16>,
    %c45 = arith.constant 45 : index
    %c0_83 = arith.constant 0 : index
    %77 = vector.load %arg13[%c45, %c0_83] : memref<72x8xbf16, #tpu.memory_space<vmem>>, vector<8x8xbf16>
    %c61 = arith.constant 61 : index
    %c0_84 = arith.constant 0 : index
    %78 = vector.load %arg14[%c61, %c0_84] : memref<108x8xbf16, #tpu.memory_space<vmem>>, vector<8x8xbf16>
    tpu.vector_store %arg14[%c61, %c0_84], %77 {strides = array<i32>} : memref<108x8xbf16, #tpu.memory_space<vmem>>, vector<8x8xbf16>,
    %c54 = arith.constant 54 : index
    %c0_85 = arith.constant 0 : index
    %79 = vector.load %arg13[%c54, %c0_85] : memref<72x8xbf16, #tpu.memory_space<vmem>>, vector<8x8xbf16>
    %c71 = arith.constant 71 : index
    %c0_86 = arith.constant 0 : index
    %80 = vector.load %arg14[%c71, %c0_86] : memref<108x8xbf16, #tpu.memory_space<vmem>>, vector<8x8xbf16>
    tpu.vector_store %arg14[%c71, %c0_86], %79 {strides = array<i32>} : memref<108x8xbf16, #tpu.memory_space<vmem>>, vector<8x8xbf16>,
    %c63 = arith.constant 63 : index
    %c0_87 = arith.constant 0 : index
    %81 = vector.load %arg13[%c63, %c0_87] : memref<72x8xbf16, #tpu.memory_space<vmem>>, vector<8x8xbf16>
    %c81 = arith.constant 81 : index
    %c0_88 = arith.constant 0 : index
    %82 = vector.load %arg14[%c81, %c0_88] : memref<108x8xbf16, #tpu.memory_space<vmem>>, vector<8x8xbf16>
    tpu.vector_store %arg14[%c81, %c0_88], %81 {strides = array<i32>} : memref<108x8xbf16, #tpu.memory_space<vmem>>, vector<8x8xbf16>,
    %cst_89 = arith.constant 0.000000e+00 : f32
    %83 = vector.broadcast %cst_89 : f32 to vector<80x8xf32>
    %c0_90 = arith.constant 0 : index
    %c0_91 = arith.constant 0 : index
    %84 = vector.load %arg14[%c0_90, %c0_91] : memref<108x8xbf16, #tpu.memory_space<vmem>>, vector<80x8xbf16>
    %c0_92 = arith.constant 0 : index
    %c0_93 = arith.constant 0 : index
    %c0_94 = arith.constant 0 : index
    %85 = vector.load %arg5[%c0_92, %c0_93, %c0_94] : memref<9x8x8xbf16, #tpu.memory_space<vmem>>, vector<1x8x8xbf16>
    %86 = vector.shape_cast %85 : vector<1x8x8xbf16> to vector<8x8xbf16>
    %cst_95 = arith.constant dense<0.000000e+00> : vector<80x8xf32>
    %87 = tpu.matmul %84, %86, %cst_95 {dimension_numbers = #tpu.dot_dimension_numbers<[1], [0], [0], [1], [0, 0, 1, 1], [], []>} : vector<80x8xbf16>, vector<8x8xbf16>, vector<80x8xf32> -> vector<80x8xf32>
    %88 = arith.addf %83, %87 : vector<80x8xf32>
    %c1_96 = arith.constant 1 : index
    %c0_97 = arith.constant 0 : index
    %89 = vector.load %arg14[%c1_96, %c0_97] : memref<108x8xbf16, #tpu.memory_space<vmem>>, vector<80x8xbf16>
    %c1_98 = arith.constant 1 : index
    %c0_99 = arith.constant 0 : index
    %c0_100 = arith.constant 0 : index
    %90 = vector.load %arg5[%c1_98, %c0_99, %c0_100] : memref<9x8x8xbf16, #tpu.memory_space<vmem>>, vector<1x8x8xbf16>
    %91 = vector.shape_cast %90 : vector<1x8x8xbf16> to vector<8x8xbf16>
    %cst_101 = arith.constant dense<0.000000e+00> : vector<80x8xf32>
    %92 = tpu.matmul %89, %91, %cst_101 {dimension_numbers = #tpu.dot_dimension_numbers<[1], [0], [0], [1], [0, 0, 1, 1], [], []>} : vector<80x8xbf16>, vector<8x8xbf16>, vector<80x8xf32> -> vector<80x8xf32>
    %93 = arith.addf %88, %92 : vector<80x8xf32>
    %c2_102 = arith.constant 2 : index
    %c0_103 = arith.constant 0 : index
    %94 = vector.load %arg14[%c2_102, %c0_103] : memref<108x8xbf16, #tpu.memory_space<vmem>>, vector<80x8xbf16>
    %c2_104 = arith.constant 2 : index
    %c0_105 = arith.constant 0 : index
    %c0_106 = arith.constant 0 : index
    %95 = vector.load %arg5[%c2_104, %c0_105, %c0_106] : memref<9x8x8xbf16, #tpu.memory_space<vmem>>, vector<1x8x8xbf16>
    %96 = vector.shape_cast %95 : vector<1x8x8xbf16> to vector<8x8xbf16>
    %cst_107 = arith.constant dense<0.000000e+00> : vector<80x8xf32>
    %97 = tpu.matmul %94, %96, %cst_107 {dimension_numbers = #tpu.dot_dimension_numbers<[1], [0], [0], [1], [0, 0, 1, 1], [], []>} : vector<80x8xbf16>, vector<8x8xbf16>, vector<80x8xf32> -> vector<80x8xf32>
    %98 = arith.addf %93, %97 : vector<80x8xf32>
    %c10_108 = arith.constant 10 : index
    %c0_109 = arith.constant 0 : index
    %99 = vector.load %arg14[%c10_108, %c0_109] : memref<108x8xbf16, #tpu.memory_space<vmem>>, vector<80x8xbf16>
    %c3_110 = arith.constant 3 : index
    %c0_111 = arith.constant 0 : index
    %c0_112 = arith.constant 0 : index
    %100 = vector.load %arg5[%c3_110, %c0_111, %c0_112] : memref<9x8x8xbf16, #tpu.memory_space<vmem>>, vector<1x8x8xbf16>
    %101 = vector.shape_cast %100 : vector<1x8x8xbf16> to vector<8x8xbf16>
    %cst_113 = arith.constant dense<0.000000e+00> : vector<80x8xf32>
    %102 = tpu.matmul %99, %101, %cst_113 {dimension_numbers = #tpu.dot_dimension_numbers<[1], [0], [0], [1], [0, 0, 1, 1], [], []>} : vector<80x8xbf16>, vector<8x8xbf16>, vector<80x8xf32> -> vector<80x8xf32>
    %103 = arith.addf %98, %102 : vector<80x8xf32>
    %c11_114 = arith.constant 11 : index
    %c0_115 = arith.constant 0 : index
    %104 = vector.load %arg14[%c11_114, %c0_115] : memref<108x8xbf16, #tpu.memory_space<vmem>>, vector<80x8xbf16>
    %c4_116 = arith.constant 4 : index
    %c0_117 = arith.constant 0 : index
    %c0_118 = arith.constant 0 : index
    %105 = vector.load %arg5[%c4_116, %c0_117, %c0_118] : memref<9x8x8xbf16, #tpu.memory_space<vmem>>, vector<1x8x8xbf16>
    %106 = vector.shape_cast %105 : vector<1x8x8xbf16> to vector<8x8xbf16>
    %cst_119 = arith.constant dense<0.000000e+00> : vector<80x8xf32>
    %107 = tpu.matmul %104, %106, %cst_119 {dimension_numbers = #tpu.dot_dimension_numbers<[1], [0], [0], [1], [0, 0, 1, 1], [], []>} : vector<80x8xbf16>, vector<8x8xbf16>, vector<80x8xf32> -> vector<80x8xf32>
    %108 = arith.addf %103, %107 : vector<80x8xf32>
    %c12 = arith.constant 12 : index
    %c0_120 = arith.constant 0 : index
    %109 = vector.load %arg14[%c12, %c0_120] : memref<108x8xbf16, #tpu.memory_space<vmem>>, vector<80x8xbf16>
    %c5_121 = arith.constant 5 : index
    %c0_122 = arith.constant 0 : index
    %c0_123 = arith.constant 0 : index
    %110 = vector.load %arg5[%c5_121, %c0_122, %c0_123] : memref<9x8x8xbf16, #tpu.memory_space<vmem>>, vector<1x8x8xbf16>
    %111 = vector.shape_cast %110 : vector<1x8x8xbf16> to vector<8x8xbf16>
    %cst_124 = arith.constant dense<0.000000e+00> : vector<80x8xf32>
    %112 = tpu.matmul %109, %111, %cst_124 {dimension_numbers = #tpu.dot_dimension_numbers<[1], [0], [0], [1], [0, 0, 1, 1], [], []>} : vector<80x8xbf16>, vector<8x8xbf16>, vector<80x8xf32> -> vector<80x8xf32>
    %113 = arith.addf %108, %112 : vector<80x8xf32>
    %c20 = arith.constant 20 : index
    %c0_125 = arith.constant 0 : index
    %114 = vector.load %arg14[%c20, %c0_125] : memref<108x8xbf16, #tpu.memory_space<vmem>>, vector<80x8xbf16>
    %c6_126 = arith.constant 6 : index
    %c0_127 = arith.constant 0 : index
    %c0_128 = arith.constant 0 : index
    %115 = vector.load %arg5[%c6_126, %c0_127, %c0_128] : memref<9x8x8xbf16, #tpu.memory_space<vmem>>, vector<1x8x8xbf16>
    %116 = vector.shape_cast %115 : vector<1x8x8xbf16> to vector<8x8xbf16>
    %cst_129 = arith.constant dense<0.000000e+00> : vector<80x8xf32>
    %117 = tpu.matmul %114, %116, %cst_129 {dimension_numbers = #tpu.dot_dimension_numbers<[1], [0], [0], [1], [0, 0, 1, 1], [], []>} : vector<80x8xbf16>, vector<8x8xbf16>, vector<80x8xf32> -> vector<80x8xf32>
    %118 = arith.addf %113, %117 : vector<80x8xf32>
    %c21_130 = arith.constant 21 : index
    %c0_131 = arith.constant 0 : index
    %119 = vector.load %arg14[%c21_130, %c0_131] : memref<108x8xbf16, #tpu.memory_space<vmem>>, vector<80x8xbf16>
    %c7_132 = arith.constant 7 : index
    %c0_133 = arith.constant 0 : index
    %c0_134 = arith.constant 0 : index
    %120 = vector.load %arg5[%c7_132, %c0_133, %c0_134] : memref<9x8x8xbf16, #tpu.memory_space<vmem>>, vector<1x8x8xbf16>
    %121 = vector.shape_cast %120 : vector<1x8x8xbf16> to vector<8x8xbf16>
    %cst_135 = arith.constant dense<0.000000e+00> : vector<80x8xf32>
    %122 = tpu.matmul %119, %121, %cst_135 {dimension_numbers = #tpu.dot_dimension_numbers<[1], [0], [0], [1], [0, 0, 1, 1], [], []>} : vector<80x8xbf16>, vector<8x8xbf16>, vector<80x8xf32> -> vector<80x8xf32>
    %123 = arith.addf %118, %122 : vector<80x8xf32>
    %c22 = arith.constant 22 : index
    %c0_136 = arith.constant 0 : index
    %124 = vector.load %arg14[%c22, %c0_136] : memref<108x8xbf16, #tpu.memory_space<vmem>>, vector<80x8xbf16>
    %c8_137 = arith.constant 8 : index
    %c0_138 = arith.constant 0 : index
    %c0_139 = arith.constant 0 : index
    %125 = vector.load %arg5[%c8_137, %c0_138, %c0_139] : memref<9x8x8xbf16, #tpu.memory_space<vmem>>, vector<1x8x8xbf16>
    %126 = vector.shape_cast %125 : vector<1x8x8xbf16> to vector<8x8xbf16>
    %cst_140 = arith.constant dense<0.000000e+00> : vector<80x8xf32>
    %127 = tpu.matmul %124, %126, %cst_140 {dimension_numbers = #tpu.dot_dimension_numbers<[1], [0], [0], [1], [0, 0, 1, 1], [], []>} : vector<80x8xbf16>, vector<8x8xbf16>, vector<80x8xf32> -> vector<80x8xf32>
    %128 = arith.addf %123, %127 : vector<80x8xf32>
    %c0_141 = arith.constant 0 : index
    %c0_142 = arith.constant 0 : index
    %129 = vector.load %arg6[%c0_141, %c0_142] : memref<1x8xf32, #tpu.memory_space<vmem>>, vector<1x8xf32>
    %130 = vector.broadcast %129 : vector<1x8xf32> to vector<80x8xf32>
    %131 = arith.mulf %128, %130 : vector<80x8xf32>
    %c0_143 = arith.constant 0 : index
    %c0_144 = arith.constant 0 : index
    %132 = vector.load %arg7[%c0_143, %c0_144] : memref<1x8xf32, #tpu.memory_space<vmem>>, vector<1x8xf32>
    %133 = vector.broadcast %132 : vector<1x8xf32> to vector<80x8xf32>
    %134 = arith.addf %131, %133 : vector<80x8xf32>
    %c0_145 = arith.constant 0 : index
    %c0_146 = arith.constant 0 : index
    %c0_147 = arith.constant 0 : index
    %135 = vector.load %arg11[%c0_145, %c0_146, %c0_147] : memref<1x80x4xbf16, #tpu.memory_space<vmem>>, vector<1x80x4xbf16>
    %136 = vector.shape_cast %135 : vector<1x80x4xbf16> to vector<80x4xbf16>
    %c0_148 = arith.constant 0 : index
    %c0_149 = arith.constant 0 : index
    %137 = vector.load %arg8[%c0_148, %c0_149] : memref<4x8xbf16, #tpu.memory_space<vmem>>, vector<4x8xbf16>
    %cst_150 = arith.constant dense<0.000000e+00> : vector<80x8xf32>
    %138 = tpu.matmul %136, %137, %cst_150 {dimension_numbers = #tpu.dot_dimension_numbers<[1], [0], [0], [1], [0, 0, 1, 1], [], []>} : vector<80x4xbf16>, vector<4x8xbf16>, vector<80x8xf32> -> vector<80x8xf32>
    %c0_151 = arith.constant 0 : index
    %c0_152 = arith.constant 0 : index
    %139 = vector.load %arg9[%c0_151, %c0_152] : memref<1x8xf32, #tpu.memory_space<vmem>>, vector<1x8xf32>
    %140 = vector.broadcast %139 : vector<1x8xf32> to vector<80x8xf32>
    %141 = arith.mulf %138, %140 : vector<80x8xf32>
    %142 = arith.addf %134, %141 : vector<80x8xf32>
    %c0_153 = arith.constant 0 : index
    %c0_154 = arith.constant 0 : index
    %143 = vector.load %arg10[%c0_153, %c0_154] : memref<1x8xf32, #tpu.memory_space<vmem>>, vector<1x8xf32>
    %144 = vector.broadcast %143 : vector<1x8xf32> to vector<80x8xf32>
    %145 = arith.addf %142, %144 : vector<80x8xf32>
    %cst_155 = arith.constant 0.000000e+00 : f32
    %146 = vector.broadcast %cst_155 : f32 to vector<80x8xf32>
    %147 = arith.maximumf %145, %146 : vector<80x8xf32>
    %148 = arith.truncf %147 : vector<80x8xf32> to vector<80x8xbf16>
    %c0_156 = arith.constant 0 : index
    %c0_157 = arith.constant 0 : index
    %c0_158 = arith.constant 0 : index
    %149 = vector.load %arg12[%c0_156, %c0_157, %c0_158] : memref<1x80x8xbf16, #tpu.memory_space<vmem>>, vector<1x80x8xbf16>
    %150 = vector.shape_cast %149 : vector<1x80x8xbf16> to vector<80x8xbf16>
    %151 = vector.shape_cast %148 : vector<80x8xbf16> to vector<1x80x8xbf16>
    tpu.vector_store %arg12[%c0_156, %c0_157, %c0_158], %151 {strides = array<i32>} : memref<1x80x8xbf16, #tpu.memory_space<vmem>>, vector<1x80x8xbf16>,
    return
  }
  func.func @transform_0(%arg0: i32) -> (i32, i32, i32, i32) {
    %c0_i32 = arith.constant 0 : i32
    %c0_i32_0 = arith.constant 0 : i32
    %c0_i32_1 = arith.constant 0 : i32
    %c0_i32_2 = arith.constant 0 : i32
    return %arg0, %c0_i32, %c0_i32_0, %c0_i32_1 : i32, i32, i32, i32
  }
  func.func @transform_1(%arg0: i32) -> (i32, i32, i32) {
    %c0_i32 = arith.constant 0 : i32
    %c0_i32_0 = arith.constant 0 : i32
    %c0_i32_1 = arith.constant 0 : i32
    %c0_i32_2 = arith.constant 0 : i32
    return %c0_i32, %c0_i32_0, %c0_i32_1 : i32, i32, i32
  }
  func.func @transform_2(%arg0: i32) -> (i32, i32) {
    %c0_i32 = arith.constant 0 : i32
    %c0_i32_0 = arith.constant 0 : i32
    %c0_i32_1 = arith.constant 0 : i32
    return %c0_i32, %c0_i32_0 : i32, i32
  }
  func.func @transform_3(%arg0: i32) -> (i32, i32) {
    %c0_i32 = arith.constant 0 : i32
    %c0_i32_0 = arith.constant 0 : i32
    %c0_i32_1 = arith.constant 0 : i32
    return %c0_i32, %c0_i32_0 : i32, i32
  }
  func.func @transform_4(%arg0: i32) -> (i32, i32, i32) {
    %c0_i32 = arith.constant 0 : i32
    %c0_i32_0 = arith.constant 0 : i32
    %c0_i32_1 = arith.constant 0 : i32
    %c0_i32_2 = arith.constant 0 : i32
    return %c0_i32, %c0_i32_0, %c0_i32_1 : i32, i32, i32
  }
  func.func @transform_5(%arg0: i32) -> (i32, i32) {
    %c0_i32 = arith.constant 0 : i32
    %c0_i32_0 = arith.constant 0 : i32
    %c0_i32_1 = arith.constant 0 : i32
    return %c0_i32, %c0_i32_0 : i32, i32
  }
  func.func @transform_6(%arg0: i32) -> (i32, i32) {
    %c0_i32 = arith.constant 0 : i32
    %c0_i32_0 = arith.constant 0 : i32
    %c0_i32_1 = arith.constant 0 : i32
    return %c0_i32, %c0_i32_0 : i32, i32
  }
  func.func @transform_7(%arg0: i32) -> (i32, i32) {
    %c0_i32 = arith.constant 0 : i32
    %c0_i32_0 = arith.constant 0 : i32
    %c0_i32_1 = arith.constant 0 : i32
    return %c0_i32, %c0_i32_0 : i32, i32
  }
  func.func @transform_8(%arg0: i32) -> (i32, i32) {
    %c0_i32 = arith.constant 0 : i32
    %c0_i32_0 = arith.constant 0 : i32
    %c0_i32_1 = arith.constant 0 : i32
    return %c0_i32, %c0_i32_0 : i32, i32
  }
  func.func @transform_9(%arg0: i32) -> (i32, i32) {
    %c0_i32 = arith.constant 0 : i32
    %c0_i32_0 = arith.constant 0 : i32
    %c0_i32_1 = arith.constant 0 : i32
    return %c0_i32, %c0_i32_0 : i32, i32
  }
  func.func @transform_10(%arg0: i32) -> (i32, i32, i32) {
    %c0_i32 = arith.constant 0 : i32
    %c0_i32_0 = arith.constant 0 : i32
    %c0_i32_1 = arith.constant 0 : i32
    return %arg0, %c0_i32, %c0_i32_0 : i32, i32, i32
  }
  func.func @transform_11(%arg0: i32) -> (i32, i32, i32) {
    %c0_i32 = arith.constant 0 : i32
    %c0_i32_0 = arith.constant 0 : i32
    %c0_i32_1 = arith.constant 0 : i32
    return %arg0, %c0_i32, %c0_i32_0 : i32, i32, i32
  }
}

</mosaic_0001>

<bundles_post_ra>
// kernel: basic_block_forward.1
= control target key start
LH: loop header
LB: loop body
LE: loop exit
PB: predicated region body
PF: predicated region fallthrough
CT: control target
= control target key end

     0   :  { %s4908_s17 = smov 0   ;;  %s5845_s0 = inlined_call_operand.vmem [shape: bf16[2,4,89,4], index: 0, kind: input, shape index: {}]   ;;  %s5846_s1 = inlined_call_operand.vmem [shape: bf16[9,4,8], index: 1, kind: input, shape index: {}]   ;;  %s5847_s2 = inlined_call_operand.vmem [shape: f32[1,8], index: 2, kind: input, shape index: {}]   ;;  %s5848_s3 = inlined_call_operand.vmem [shape: f32[1,8], index: 3, kind: input, shape index: {}]   ;;  %s5849_s4 = inlined_call_operand.vmem [shape: bf16[9,8,8], index: 4, kind: input, shape index: {}]   ;;  %s5850_s5 = inlined_call_operand.vmem [shape: f32[1,8], index: 5, kind: input, shape index: {}]   ;;  %s5851_s6 = inlined_call_operand.vmem [shape: f32[1,8], index: 6, kind: input, shape index: {}]   ;;  %s5852_s7 = inlined_call_operand.vmem [shape: bf16[4,8], index: 7, kind: input, shape index: {}]   ;;  %s5853_s8 = inlined_call_operand.vmem [shape: f32[1,8], index: 8, kind: input, shape index: {}]   ;;  %s5854_s9 = inlined_call_operand.vmem [shape: f32[1,8], index: 9, kind: input, shape index: {}]   ;;  %s5855_s10 = inlined_call_operand.vmem [shape: bf16[2,80,4], index: 10, kind: input, shape index: {}]   ;;  %s5856_s11 = inlined_call_operand.vmem [shape: bf16[2,80,8], index: 11, kind: output, shape index: {}]  }
   0x1 LB: > { %s3622_s18 = sadd.s32 4294967295, %s4843_s17   ;;  %p3626_p0 = scmp.ge.s32.totalorder %s4843_s17, 1  ;;  %s4843_s17 = sphi %s4908_s17, %s21_s17  }
   0x2   : > { %p347_p1 = scmp.lt.s32.totalorder %s4843_s17, 3 }
   0x4   : > { %p348_p2 = pnand %p3626_p0, %p347_p1 }
   0x5   : > { %v3639_v0 = vld [vmem:[%s5846_s1 + $0x2] sm:$0x3] (!%p348_p2)  ;;  %vm5861_vm0 = vcmask (!%p348_p2), 1041408   ;;  %p392_p3 = scmp.lt.s32.totalorder (!%p348_p2), %s3622_s18, 1  ;;  %v4845_v1 = vmov (!%p348_p2), 0.0   ;;  %vm5858_vm1 = vmmov (!%p348_p2), 0  }
   0x6   : > { %351 = sbr.rel (%p348_p2) target bundleno = 1159 (0x487), region = 64  ;;  %4020 = vmatprep.subr.bf16.mxu0 (!%p348_p2), %v4845_v1  ;;  %v471_v2 = vsel (!%p348_p2), %vm5861_vm0, %v3639_v0, 0  ;;  %4022 = vmatprep.mubr.msk.bf16.mxu0 (!%p348_p2), %vm5858_vm1, %v4845_v1  ;;  %v417_v3 = vld [vmem:[%s5846_s1] sm:$0x3] (!%p348_p2)  ;;  %vm5857_vm2 = vcmask (!%p348_p2), 31744   ;;  %vm5863_vm4 = vcmask (!%p348_p2), 1046528  }
   0x7   : > { %4021 = vmatpush3.bf16.msra.mxu0 (!%p348_p2), %v471_v2  ;;  %4438 = vmatprep.subr.bf16.mxu1 (!%p348_p2), %v4845_v1  ;;  %v584_v5 = vsel (!%p348_p2), %vm5861_vm0, %v417_v3, 0  ;;  %v3660_v8 = vld [vmem:[%s5846_s1 + $0x4] sm:$0x3] (!%p348_p2)  ;;  %vm5860_vm3 = vsmask.f32 (!%p348_p2), 7424  ;;  %vm1820_vm5 = vcmask (!%p348_p2), 60416  }
   0x8   : > { %4042 = vmatprep.subr.bf16.mxu0 (!%p348_p2), %v4845_v1  ;;  %4439 = vmatpush3.bf16.msra.mxu1 (!%p348_p2), %v471_v2  ;;  %v751_v10 = vsel (!%p348_p2), %vm5861_vm0, %v3660_v8, 0  ;;  %v3680_v24 = vld [vmem:[%s5846_s1 + $0x6] sm:$0x3] (!%p348_p2)  ;;  %v3700_v46 = vld [vmem:[%s5846_s1 + $0x8] sm:$0x3] (!%p348_p2)  ;;  %vm1843_vm6 = vcmask (!%p348_p2), 58368  }
   0x9   : > { %4034 = vmatprep.mubr.msk.bf16.mxu1 (!%p348_p2), %vm5858_vm1, %v4845_v1  ;;  %4218 = vmatprep.subr.bf16.mxu1 (!%p348_p2), %v4845_v1  ;;  %v885_v28 = vsel (!%p348_p2), %vm5861_vm0, %v3680_v24, 0  ;;  %v1019_v48 = vsel (!%p348_p2), %vm5861_vm0, %v3700_v46, 0  ;;  %v3721_v53 = vld [vmem:[%s5846_s1 + $0xa] sm:$0x3] (!%p348_p2)  ;;  %vm5862_vm7 = vcmask (!%p348_p2), 1043456   ;;  %vm1882_vm8 = vcmask (!%p348_p2), 60418  }
   0xa   : > { %v1194_v55 = vsel (!%p348_p2), %vm5861_vm0, %v3721_v53, 0  ;;  %vm1883_vm9 = vsmask.f32 (!%p348_p2), 7946  ;;  %vm1857_vm10 = vcmask (!%p348_p2), 60417   ;;  %vm1858_vm11 = vsmask.f32 (!%p348_p2), 7942 }
   0xb   : > { %vm1864_vm12 = vsmask.f32 (!%p348_p2), 1280  ;;  %vm5245_vm13 = vmand (!%p348_p2), %vm1882_vm8, %vm1883_vm9  ;;  %vm1874_vm15 = vcmask (!%p348_p2), 1045508   ;;  %vm1918_vm8 = vcmask (!%p348_p2), 60419   ;;  %vm1919_vm9 = vsmask.f32 (!%p348_p2), 7950 }
   0xc   : > { %vm5253_vm14 = vmand (!%p348_p2), %vm1857_vm10, %vm1858_vm11  ;;  %vm1934_vm10 = vcmask (!%p348_p2), 1042432   ;;  %vm1925_vm11 = vsmask.f32 (!%p348_p2), 3328 }
   0xd   : > { %s5922_s18 = smov (!%p392_p3, %s3622_s18), 1 }
   0xe   : > { %s4755_s21 = smul.u32 192, %s5922_s18 }
   0xf   : > { %s4756_s25 = smul.u32 40, %s5922_s18 }
  0x10   : > { %s4937_s26 = scalar_lea.vmem %s5845_s0, %s4755_s21 }
  0x11   : > { %v4768_v4 = vld [vmem:[%s4937_s26 + $0x30] sm:$0xff]   ;;  %v4769_v6 = vld [vmem:[%s4937_s26 + $0x38] sm:$0xff]   ;;  %v4770_v7 = vld [vmem:[%s4937_s26 + $0x40] sm:$0xff]   ;;  %s401_s28 = scalar_lea.vmem %s5855_s10, %s4756_s25  ;;  %s5785_s29 = scalar_lea.vmem %s5856_s11, %s4756_s25 }
  0x12   : > { %4023 = vmatmul.mubr.msk.bf16.vlgmr.msra.gmra.mrb[0].mxu0 %vm5857_vm2, %v4768_v4  ;;  %v4771_v9 = vld [vmem:[%s4937_s26] sm:$0xff]   ;;  %v4772_v11 = vld [vmem:[%s4937_s26 + $0x8] sm:$0xff]   ;;  %v4773_v12 = vld [vmem:[%s4937_s26 + $0x10] sm:$0xff]  }
  0x13   : > { %4043 = vmatpush3.bf16.msra.mxu0 %v584_v5  ;;  %4026 = vmatprep.mubr.msk.bf16.mxu0 %vm5858_vm1, %v4845_v1  ;;  %v4774_v13 = vld [vmem:[%s4937_s26 + $0x18] sm:$0xff]   ;;  %v4776_v14 = vld [vmem:[%s4937_s26] sm:$0xff]   ;;  %v4777_v15 = vld [vmem:[%s4937_s26 + $0x8] sm:$0xff]  }
  0x14   : > { %4064 = vmatprep.subr.bf16.mxu0 %v4845_v1  ;;  %v699_v16 = vshll.u32 %v4776_v14, 16  ;;  %v4775_v17 = vld [vmem:[%s4937_s26 + $0x20] ss:$0 sps:$4 sm:$0xff]   ;;  %v697_v18 = vshrl.u32 %v4776_v14, 16  ;;  %v704_v20 = vshll.u32 %v4777_v15, 16  ;;  %v4778_v23 = vld [vmem:[%s4937_s26 + $0x10] sm:$0xff]  }
  0x15   : > { %v708_v26 = vshrl.u32 %v4777_v15, 16  ;;  %v712_v27 = vshll.u32 %v4778_v23, 16  ;;  %v4779_v31 = vld [vmem:[%s4937_s26 + $0x18] sm:$0xff]   ;;  %v716_v33 = vshrl.u32 %v4778_v23, 16  ;;  %v4780_v37 = vld [vmem:[%s4937_s26 + $0x20] sm:$0x1f]  }
  0x16   : > { %v701_v19 = vrot.slane %v699_v16, 1  ;;  %v706_v22 = vrot.slane %v704_v20, 1  ;;  %v720_v34 = vshll.u32 %v4779_v31, 16  ;;  %v724_v39 = vshrl.u32 %v4779_v31, 16  ;;  %v4781_v47 = vld [vmem:[%s4937_s26 + $0x60] sm:$0xff]   ;;  %v4782_v49 = vld [vmem:[%s4937_s26 + $0x68] sm:$0xff]  }
  0x17   : > { %v714_v30 = vrot.slane %v712_v27, 1  ;;  %v728_v40 = vshll.u32 %v4780_v37, 16  ;;  %v732_v44 = vshrl.u32 %v4780_v37, 16  ;;  %v4783_v50 = vld [vmem:[%s4937_s26 + $0x70] sm:$0xff]   ;;  %v4784_v51 = vld [vmem:[%s4937_s26 + $0x78] sm:$0xff]   ;;  %v4788_v57 = vld [vmem:[%s4937_s26 + $0xa0] sm:$0xff]  }
  0x18   : > { %v702_v21 = vor.u32 %v701_v19, %v697_v18  ;;  %v710_v29 = vor.u32 %v708_v26, %v706_v22  ;;  %v722_v36 = vrot.slane %v720_v34, 1  ;;  %v4785_v52 = vld [vmem:[%s4937_s26 + $0x80] ss:$0 sps:$4 sm:$0xff]   ;;  %v4786_v54 = vld [vmem:[%s4937_s26 + $0x90] sm:$0xff]   ;;  %v4787_v56 = vld [vmem:[%s4937_s26 + $0x98] sm:$0xff]  }
  0x19   : > { %v718_v35 = vor.u32 %v716_v33, %v714_v30  ;;  %v730_v42 = vrot.slane %v728_v40, 1  ;;  %v4789_v58 = vld [vmem:[%s4937_s26 + $0xa8] sm:$0xff]   ;;  %v4791_v59 = vld [vmem:[%s4937_s26 + $0x60] sm:$0xff]   ;;  %v4790_v62 = vld [vmem:[%s4937_s26 + $0xb0] ss:$0 sps:$4 sm:$0xff]  }
  0x1a   : > { %4027 = vmatmul.mubr.msk.bf16.gmra.mrb[4].mxu0 %vm5857_vm2, %v4769_v6  ;;  %v707_v25 = vsel %vm5860_vm3, %v702_v21, %v706_v22  ;;  %v715_v32 = vsel %vm5860_vm3, %v710_v29, %v714_v30  ;;  %v726_v41 = vor.u32 %v724_v39, %v722_v36  ;;  %v4792_v60 = vld [vmem:[%s4937_s26 + $0x68] sm:$0xff]   ;;  %v1142_v61 = vshll.u32 %v4791_v59, 16  ;;  %v4793_v5 = vld [vmem:[%s4937_s26 + $0x70] sm:$0xff]   ;;  %v4795_v20 = vld [vmem:[%s4937_s26 + $0x80] sm:$0x1f]  }
  0x1b   : > { %4030 = vmatprep.mubr.msk.bf16.mxu0 %vm5858_vm1, %v4845_v1  ;;  %v723_v38 = vsel %vm5860_vm3, %v718_v35, %v722_v36  ;;  %v734_v45 = vor.u32 %v732_v44, %v730_v42  ;;  %v1140_v63 = vshrl.u32 %v4791_v59, 16  ;;  %v1147_v2 = vshll.u32 %v4792_v60, 16  ;;  %v3732_v6 = vld [vmem:[%s5846_s1 + $0xc] sm:$0x3]  ;;  %v4808_v26 = vld [vmem:[%s4937_s26 + $0x50] ss:$0 sps:$4 sm:$0xff]  }
  0x1c   : > { %v731_v43 = vsel %vm5860_vm3, %v726_v41, %v730_v42  ;;  %v1144_v0 = vrot.slane %v1142_v61, 1  ;;  %v1151_v8 = vshrl.u32 %v4792_v60, 16  ;;  %v1159_v15 = vshrl.u32 %v4793_v5, 16  ;;  %v1277_v27 = vld [vmem:[%s4937_s26 + $0x4] sm:$0xf]  ;;  %v5104_v40 = vld [vmem:[%s4937_s26 + $0x14] sm:$0xff]  }
  0x1d   : > { %v1149_v4 = vrot.slane %v1147_v2, 1  ;;  %v1171_v23 = vshll.u32 %v4795_v20, 16  ;;  %v1175_v31 = vshrl.u32 %v4795_v20, 16  ;;  %v3753_v41 = vld [vmem:[%s5846_s1 + $0xe] sm:$0x3]  ;;  %v1330_v44 = vshll.u32 %v5104_v40, 16 }
  0x1e   : > { %v1145_v3 = vor.u32 %v1144_v0, %v1140_v63  ;;  %v4801_v61 = vld [vmem:[%s4937_s26 + $0x34] sm:$0xff]   ;;  %v4802_v63 = vld [vmem:[%s4937_s26 + $0x3c] sm:$0xff]  }
  0x1f   : > { %v1492_v0 = vshll.u32 %v4801_v61, 16 }
  0x22   : > { %4031 = vmatmul.mubr.msk.bf16.gmra.mrb[8].mxu0 %vm5857_vm2, %v4770_v7  ;;  %v1150_v7 = vsel %vm5860_vm3, %v1145_v3, %v1149_v4  ;;  %v1490_v3 = vshrl.u32 %v4801_v61, 16 }
  0x23   : > { %4044 = vmatprep.mubr.msk.bf16.mxu0 %vm5858_vm1, %v4845_v1 }
  0x2a   : > { %4045 = vmatmul.mubr.msk.bf16.vlgmr.msra.gmra.mrb[0].mxu0 %vm5857_vm2, %v4771_v9  ;;  %v1155_v9 = vshll.u32 %v4793_v5, 16  ;;  %v1497_v5 = vshll.u32 %v4802_v63, 16 }
  0x2b   : > { %4065 = vmatpush3.bf16.msra.mxu0 %v751_v10  ;;  %4048 = vmatprep.mubr.msk.bf16.mxu0 %vm5858_vm1, %v4845_v1  ;;  %v1369_v10 = vsel %vm5861_vm0, %v3732_v6, 0 }
  0x2c   : > { %4086 = vmatprep.subr.bf16.mxu0 %v4845_v1 }
  0x32   : > { %4049 = vmatmul.mubr.msk.bf16.gmra.mrb[4].mxu0 %vm5857_vm2, %v4772_v11  ;;  %v1153_v11 = vor.u32 %v1151_v8, %v1149_v4  ;;  %v1494_v4 = vrot.slane %v1492_v0, 1  ;;  %v4803_v8 = vld [vmem:[%s4937_s26 + $0x44] sm:$0xff]  }
  0x33   : > { %4052 = vmatprep.mubr.msk.bf16.mxu0 %vm5858_vm1, %v4845_v1 }
  0x34   : > { %v1495_v6 = vor.u32 %v1494_v4, %v1490_v3 }
  0x3a   : > { %4053 = vmatmul.mubr.msk.bf16.gmra.mrb[8].mxu0 %vm5857_vm2, %v4773_v12  ;;  %v1157_v12 = vrot.slane %v1155_v9, 1  ;;  %v3764_v9 = vld [vmem:[%s5846_s1 + $0x10] sm:$0x3] }
  0x3b   : > { %4056 = vmatprep.mubr.msk.bf16.mxu0 %vm5858_vm1, %v4845_v1 }
  0x3c   : > { %v1158_v14 = vsel %vm5860_vm3, %v1153_v11, %v1157_v12  ;;  %v1161_v18 = vor.u32 %v1159_v15, %v1157_v12  ;;  %v1501_v11 = vshrl.u32 %v4802_v63, 16  ;;  %v1505_v12 = vshll.u32 %v4803_v8, 16 }
  0x3e   : > { %v1507_v15 = vrot.slane %v1505_v12, 1 }
  0x42   : > { %4057 = vmatmul.mubr.msk.bf16.gmra.mrb[12].mxu0 %vm5857_vm2, %v4774_v13  ;;  %v4794_v13 = vld [vmem:[%s4937_s26 + $0x78] sm:$0xff]  }
  0x43   : > { %4060 = vmatprep.mubr.msk.bf16.mxu0 %vm5858_vm1, %v4845_v1  ;;  %v1163_v16 = vshll.u32 %v4794_v13, 16  ;;  %v1167_v22 = vshrl.u32 %v4794_v13, 16  ;;  %v1659_v13 = vsel %vm5861_vm0, %v3764_v9, 0 }
  0x45   : > { %v1165_v19 = vrot.slane %v1163_v16, 1  ;;  %v4804_v16 = vld [vmem:[%s4937_s26 + $0x4c] sm:$0xff]  }
  0x47   : > { %v1166_v21 = vsel %vm5860_vm3, %v1161_v18, %v1165_v19  ;;  %v1169_v24 = vor.u32 %v1167_v22, %v1165_v19  ;;  %v1509_v18 = vshrl.u32 %v4803_v8, 16  ;;  %v1513_v19 = vshll.u32 %v4804_v16, 16  ;;  %v4805_v22 = vld [vmem:[%s4937_s26 + $0x54] sm:$0x1f]  }
  0x49   : > { %v1511_v20 = vor.u32 %v1509_v18, %v1507_v15 }
  0x4a   : > { %4061 = vmatmul.mubr.msk.bf16.gmra.mrb[16].mxu0 %vm5857_vm2, %v4775_v17  ;;  %v4807_v17 = vld [vmem:[%s4937_s26 + $0x48] sm:$0xff]  }
  0x4b   : > { %4066 = vmatprep.mubr.msk.bf16.mxu0 %vm5858_vm1, %v4845_v1  ;;  %4035 = vmatmul.mubr.msk.bf16.vlgmr.msra.gmra.mrb[0].mxu1 %vm5857_vm2, %v4807_v17 }
  0x4c   : > { %4038 = vmatprep.mubr.msk.bf16.mxu1 %vm5858_vm1, %v4845_v1 }
  0x52   : > { %4067 = vmatmul.mubr.msk.bf16.vlgmr.msra.gmra.mrb[0].mxu0 %vm5857_vm2, %v707_v25  ;;  %v1173_v25 = vrot.slane %v1171_v23, 1 }
  0x53   : > { %4087 = vmatpush3.bf16.msra.mxu0 %v885_v28  ;;  %4070 = vmatprep.mubr.msk.bf16.mxu0 %vm5858_vm1, %v4845_v1  ;;  %v5086_v28 = vld [vmem:[%s4937_s26 + $0x8] sm:$0xf] }
  0x54   : > { %4108 = vmatprep.subr.bf16.mxu0 %v4845_v1  ;;  %4039 = vmatmul.mubr.msk.bf16.gmra.mrb[4].mxu1 %vm5857_vm2, %v4808_v26  ;;  %v1174_v29 = vsel %vm5860_vm3, %v1169_v24, %v1173_v25  ;;  %v3733_v30 = vcombine.low %v1277_v27, %v5086_v28  ;;  %v1177_v34 = vor.u32 %v1175_v31, %v1173_v25  ;;  %v1517_v24 = vshrl.u32 %v4804_v16, 16  ;;  %v1627_v31 = vld [vmem:[%s4937_s26 + $0x4] sm:$0xe] }
  0x55   : > { %4220 = vmatprep.mubr.msk.bf16.mxu1 %vm5858_vm1, %v4845_v1  ;;  %v1521_v25 = vshll.u32 %v4805_v22, 16 }
  0x56   : > { %v1317_v33 = vshll.u32 %v3733_v30, 16  ;;  %v1315_v35 = vshrl.u32 %v3733_v30, 16  ;;  %v1525_v30 = vshrl.u32 %v4805_v22, 16 }
  0x57   : > { %v1523_v27 = vrot.slane %v1521_v25, 1 }
  0x58   : > { %v1319_v36 = vrot.slane %v1317_v33, 1 }
  0x59   : > { %v1527_v33 = vor.u32 %v1525_v30, %v1523_v27 }
  0x5a   : > { %4071 = vmatmul.mubr.msk.bf16.gmra.mrb[4].mxu0 %vm5857_vm2, %v715_v32  ;;  %v5097_v32 = vld [vmem:[%s4937_s26 + $0xc] sm:$0xff]  }
  0x5b   : > { %4074 = vmatprep.mubr.msk.bf16.mxu0 %vm5858_vm1, %v4845_v1  ;;  %v1322_v37 = vshll.u32 %v5097_v32, 16 }
  0x5d   : > { %v1324_v39 = vrot.slane %v1322_v37, 1 }
  0x62   : > { %4075 = vmatmul.mubr.msk.bf16.gmra.mrb[8].mxu0 %vm5857_vm2, %v723_v38  ;;  %v1320_v38 = vor.u32 %v1319_v36, %v1315_v35  ;;  %v1635_v36 = vrot.slane %v5097_v32, 1 }
  0x63   : > { %4078 = vmatprep.mubr.msk.bf16.mxu0 %vm5858_vm1, %v4845_v1 }
  0x64   : > { %v1325_v42 = vsel %vm5860_vm3, %v1320_v38, %v1324_v39  ;;  %v1637_v38 = vrot.slane %v5104_v40, 1 }
  0x6a   : > { %4079 = vmatmul.mubr.msk.bf16.gmra.mrb[12].mxu0 %vm5857_vm2, %v731_v43  ;;  %v1326_v43 = vshrl.u32 %v5097_v32, 16 }
  0x6b   : > { %4082 = vmatprep.mubr.msk.bf16.mxu0 %vm5858_vm1, %v4845_v1 }
  0x6c   : > { %v1328_v46 = vor.u32 %v1326_v43, %v1324_v39 }
  0x72   : > { %4083 = vmatmul.mubr.msk.bf16.gmra.mrb[16].mxu0 %vm5857_vm2, %v734_v45  ;;  %v1544_v45 = vsel %vm5861_vm0, %v3753_v41, 0 }
  0x73   : > { %4088 = vmatprep.mubr.msk.bf16.mxu0 %vm5858_vm1, %v4845_v1 }
  0x7a   : > { %4089 = vmatmul.mubr.msk.bf16.vlgmr.msra.gmra.mrb[0].mxu0 %vm5857_vm2, %v4781_v47  ;;  %v1332_v47 = vrot.slane %v1330_v44, 1 }
  0x7b   : > { %4109 = vmatpush3.bf16.msra.mxu0 %v1019_v48  ;;  %4092 = vmatprep.mubr.msk.bf16.mxu0 %vm5858_vm1, %v4845_v1  ;;  %v5117_v48 = vld [vmem:[%s4937_s26 + $0x1c] sm:$0xff]  }
  0x7c   : > { %4130 = vmatprep.subr.bf16.mxu0 %v4845_v1  ;;  %v1639_v39 = vrot.slane %v5117_v48, 1 }
  0x7e   : > { %v1640_v32 = vsel %vm5863_vm4, %v1637_v38, %v1639_v39 }
  0x82   : > { %4093 = vmatmul.mubr.msk.bf16.gmra.mrb[4].mxu0 %vm5857_vm2, %v4782_v49  ;;  %v1333_v49 = vsel %vm5860_vm3, %v1328_v46, %v1332_v47 }
  0x83   : > { %4096 = vmatprep.mubr.msk.bf16.mxu0 %vm5858_vm1, %v4845_v1 }
  0x8a   : > { %4097 = vmatmul.mubr.msk.bf16.gmra.mrb[8].mxu0 %vm5857_vm2, %v4783_v50  ;;  %v1334_v50 = vshrl.u32 %v5104_v40, 16 }
  0x8b   : > { %4100 = vmatprep.mubr.msk.bf16.mxu0 %vm5858_vm1, %v4845_v1 }
  0x92   : > { %4101 = vmatmul.mubr.msk.bf16.gmra.mrb[12].mxu0 %vm5857_vm2, %v4784_v51  ;;  %v1338_v51 = vshll.u32 %v5117_v48, 16 }
  0x93   : > { %4104 = vmatprep.mubr.msk.bf16.mxu0 %vm5858_vm1, %v4845_v1 }
  0x94   : > { %v1340_v53 = vrot.slane %v1338_v51, 1  ;;  %v3785_v51 = vld [vmem:[%s5849_s4 + $0x4] sm:$0xf] }
  0x9a   : > { %4105 = vmatmul.mubr.msk.bf16.gmra.mrb[16].mxu0 %vm5857_vm2, %v4785_v52  ;;  %v1336_v52 = vor.u32 %v1334_v50, %v1332_v47 }
  0x9b   : > { %4110 = vmatprep.mubr.msk.bf16.mxu0 %vm5858_vm1, %v4845_v1 }
  0xa2   : > { %4111 = vmatmul.mubr.msk.bf16.vlgmr.msra.gmra.mrb[0].mxu0 %vm5857_vm2, %v4786_v54  ;;  %v5127_v54 = vld [vmem:[%s4937_s26 + $0x24] sm:$0x1f]  }
  0xa3   : > { %4131 = vmatpush3.bf16.msra.mxu0 %v1194_v55  ;;  %4114 = vmatprep.mubr.msk.bf16.mxu0 %vm5858_vm1, %v4845_v1  ;;  %v1341_v55 = vsel %vm5860_vm3, %v1336_v52, %v1340_v53  ;;  %v1641_v41 = vrot.slane %v5127_v54, 1  ;;  %v2145_v52 = vsel %vm5862_vm7, %v3785_v51, 0  ;;  %vm1896_vm7 = vsmask.f32 6416 }
  0xa4   : > { %4152 = vmatprep.subr.bf16.mxu0 %v4845_v1  ;;  %4219 = vmatpush3.bf16.msra.mxu1 %v2145_v52 }
  0xa5   : > { %v1642_v40 = vsel %vm5863_vm4, %v1639_v39, %v1641_v41  ;;  %4240 = vmatprep.subr.bf16.mxu1 %v4845_v1 }
  0xaa   : > { %4115 = vmatmul.mubr.msk.bf16.gmra.mrb[4].mxu0 %vm5857_vm2, %v4787_v56  ;;  %v1342_v56 = vshrl.u32 %v5117_v48, 16 }
  0xab   : > { %4118 = vmatprep.mubr.msk.bf16.mxu0 %vm5858_vm1, %v4845_v1 }
  0xb2   : > { %4119 = vmatmul.mubr.msk.bf16.gmra.mrb[8].mxu0 %vm5857_vm2, %v4788_v57  ;;  %v1346_v57 = vshll.u32 %v5127_v54, 16 }
  0xb3   : > { %4122 = vmatprep.mubr.msk.bf16.mxu0 %vm5858_vm1, %v4845_v1 }
  0xb4   : > { %v1348_v59 = vrot.slane %v1346_v57, 1 }
  0xba   : > { %4123 = vmatmul.mubr.msk.bf16.gmra.mrb[12].mxu0 %vm5857_vm2, %v4789_v58  ;;  %v1344_v58 = vor.u32 %v1342_v56, %v1340_v53  ;;  %v5224_v53 = vld [vmem:[%s5847_s2] ss:$0 sm:$0xff] }
  0xbb   : > { %4126 = vmatprep.mubr.msk.bf16.mxu0 %vm5858_vm1, %v4845_v1 }
  0xbc   : > { %v1349_v60 = vsel %vm5860_vm3, %v1344_v58, %v1348_v59 }
  0xc2   : > { %4127 = vmatmul.mubr.msk.bf16.gmra.mrb[16].mxu0 %vm5857_vm2, %v4790_v62  ;;  %v1350_v62 = vshrl.u32 %v5127_v54, 16 }
  0xc3   : > { %4132 = vmatprep.mubr.msk.bf16.mxu0 %vm5858_vm1, %v4845_v1 }
  0xc4   : > { %v1352_v2 = vor.u32 %v1350_v62, %v1348_v59 }
  0xca   : > { %4133 = vmatmul.mubr.msk.bf16.vlgmr.msra.gmra.mrb[0].mxu0 %vm5857_vm2, %v1150_v7  ;;  %v1499_v7 = vrot.slane %v1497_v5, 1 }
  0xcb   : > { %4153 = vmatpush3.bf16.msra.mxu0 %v1369_v10  ;;  %4136 = vmatprep.mubr.msk.bf16.mxu0 %vm5858_vm1, %v4845_v1 }
  0xcc   : > { %4174 = vmatprep.subr.bf16.mxu0 %v4845_v1  ;;  %v1500_v10 = vsel %vm5860_vm3, %v1495_v6, %v1499_v7 }
  0xd2   : > { %4137 = vmatmul.mubr.msk.bf16.gmra.mrb[4].mxu0 %vm5857_vm2, %v1158_v14  ;;  %v1503_v14 = vor.u32 %v1501_v11, %v1499_v7 }
  0xd3   : > { %4140 = vmatprep.mubr.msk.bf16.mxu0 %vm5858_vm1, %v4845_v1 }
  0xd4   : > { %v1508_v17 = vsel %vm5860_vm3, %v1503_v14, %v1507_v15 }
  0xda   : > { %4141 = vmatmul.mubr.msk.bf16.gmra.mrb[8].mxu0 %vm5857_vm2, %v1166_v21  ;;  %v1515_v21 = vrot.slane %v1513_v19, 1 }
  0xdb   : > { %4144 = vmatprep.mubr.msk.bf16.mxu0 %vm5858_vm1, %v4845_v1 }
  0xdc   : > { %v1516_v23 = vsel %vm5860_vm3, %v1511_v20, %v1515_v21  ;;  %v1519_v26 = vor.u32 %v1517_v24, %v1515_v21 }
  0xe2   : > { %4145 = vmatmul.mubr.msk.bf16.gmra.mrb[12].mxu0 %vm5857_vm2, %v1174_v29  ;;  %v1524_v29 = vsel %vm5860_vm3, %v1519_v26, %v1523_v27  ;;  %vm1889_vm3 = vsmask.f32 2304 }
  0xe3   : > { %4148 = vmatprep.mubr.msk.bf16.mxu0 %vm5858_vm1, %v4845_v1 }
  0xea   : > { %4149 = vmatmul.mubr.msk.bf16.gmra.mrb[16].mxu0 %vm5857_vm2, %v1177_v34  ;;  %v3765_v34 = vcombine.low %v1627_v31, %v5086_v28  ;;  %v1638_v28 = vsel %vm5863_vm4, %v1635_v36, %v1637_v38 }
  0xeb   : > { %4154 = vmatprep.mubr.msk.bf16.mxu0 %vm5858_vm1, %v4845_v1 }
  0xec   : > { %v1634_v35 = vrot.slane %v3765_v34, 1 }
  0xee   : > { %v1636_v37 = vsel %vm5863_vm4, %v1634_v35, %v1635_v36  ;;  %vm1957_vm4 = vsmask.f32 7440 }
  0xf2   : > { %4155 = vmatmul.mubr.msk.bf16.vlgmr.msra.gmra.mrb[0].mxu0 %vm5857_vm2, %v1325_v42  ;;  %v4847_v42 = vmov 0  }
  0xf3   : > { %4175 = vmatpush3.bf16.msra.mxu0 %v1544_v45  ;;  %4158 = vmatprep.mubr.msk.bf16.mxu0 %vm5858_vm1, %v4845_v1  ;;  %1831 = vst.msk [vmem:[#allocation3 + $0x4] sm:$0xf] %vm1820_vm5, %v4847_v42  ;;  %1832 = vst.msk [vmem:[#allocation3 + $0x8] sm:$0xf] %vm1820_vm5, %v4847_v42 }
  0xf4   : > { %4196 = vmatprep.subr.bf16.mxu0 %v4845_v1  ;;  %1830 = vst.msk [vmem:[#allocation3] sm:$0xf] %vm1820_vm5, %v4847_v42  ;;  %1833 = vst.msk [vmem:[#allocation3 + $0xc] sm:$0xf] %vm1820_vm5, %v4847_v42 }
  0xf5   : > { %1834 = vst.msk [vmem:[#allocation3 + $0x10] sm:$0xf] %vm1820_vm5, %v4847_v42  ;;  %1835 = vst.msk [vmem:[#allocation3 + $0x14] sm:$0xf] %vm1820_vm5, %v4847_v42 }
  0xf6   : > { %1836 = vst.msk [vmem:[#allocation3 + $0x18] sm:$0xf] %vm1820_vm5, %v4847_v42  ;;  %1837 = vst.msk [vmem:[#allocation3 + $0x1c] sm:$0xf] %vm1820_vm5, %v4847_v42 }
  0xf7   : > { %1838 = vst.msk [vmem:[#allocation3 + $0x20] sm:$0xf] %vm1820_vm5, %v4847_v42  ;;  %1839 = vst.msk [vmem:[#allocation3 + $0x24] sm:$0xf] %vm1820_vm5, %v4847_v42 }
  0xf8   : > { %1840 = vst.msk [vmem:[#allocation3 + $0x28] sm:$0xf] %vm1820_vm5, %v4847_v42  ;;  %1841 = vst.msk [vmem:[#allocation3 + $0x2c] sm:$0xf] %vm1820_vm5, %v4847_v42 }
  0xf9   : > { %1842 = vst.msk [vmem:[#allocation3 + $0x30] sm:$0xf] %vm1820_vm5, %v4847_v42 }
  0xfa   : > { %4159 = vmatmul.mubr.msk.bf16.gmra.mrb[4].mxu0 %vm5857_vm2, %v1333_v49  ;;  %v1885_v22 = vld [vmem:[#allocation3 + $0x8] sm:$0xc]  ;;  %v1860_v34 = vld [vmem:[#allocation3 + $0x4] sm:$0xe] }
  0xfb   : > { %4162 = vmatprep.mubr.msk.bf16.mxu0 %vm5858_vm1, %v4845_v1 }
 0x102   : > { %4163 = vmatmul.mubr.msk.bf16.gmra.mrb[8].mxu0 %vm5857_vm2, %v1341_v55  ;;  %v5229_v55 = vld [vmem:[%s5848_s3] ss:$0 sm:$0xff] }
 0x103   : > { %4166 = vmatprep.mubr.msk.bf16.mxu0 %vm5858_vm1, %v4845_v1 }
 0x10a   : > { %4167 = vmatmul.mubr.msk.bf16.gmra.mrb[12].mxu0 %vm5857_vm2, %v1349_v60 }
 0x10b   : > { %4170 = vmatprep.mubr.msk.bf16.mxu0 %vm5858_vm1, %v4845_v1 }
 0x112   : > { %4171 = vmatmul.mubr.msk.bf16.gmra.mrb[16].mxu0 %vm5857_vm2, %v1352_v2 }
 0x113   : > { %4176 = vmatprep.mubr.msk.bf16.mxu0 %vm5858_vm1, %v4845_v1 }
 0x11a   : > { %4177 = vmatmul.mubr.msk.bf16.vlgmr.msra.gmra.mrb[0].mxu0 %vm5857_vm2, %v1500_v10 }
 0x11b   : > { %4197 = vmatpush3.bf16.msra.mxu0 %v1659_v13  ;;  %4180 = vmatprep.mubr.msk.bf16.mxu0 %vm5858_vm1, %v4845_v1 }
 0x11c   : > { %4416 = vmatprep.subr.bf16.mxu0 %v4845_v1 }
 0x11e   : > { %v5210_v43 = vpop.f32.mrb[0].mxu1 }
 0x11f   : > { %v4036_v44 = vpop.f32.mrb[1].mxu1 }
 0x120   : > { %v5212_v45 = vpop.f32.mrb[2].mxu1 }
 0x121   : > { %v4037_v46 = vpop.f32.mrb[3].mxu1 }
 0x122   : > { %4181 = vmatmul.mubr.msk.bf16.gmra.mrb[4].mxu0 %vm5857_vm2, %v1508_v17 }
 0x123   : > { %4184 = vmatprep.mubr.msk.bf16.mxu0 %vm5858_vm1, %v4845_v1 }
 0x127   : > { %v5214_v47 = vpop.f32.mrb[4].mxu1 }
 0x128   : > { %v4040_v48 = vpop.f32.mrb[5].mxu1 }
 0x129   : > { %v542_v49 = vpop.f32.mrb[6].mxu1  ;;  %v1988_v48 = vld [vmem:[#allocation3 + $0x1c] sm:$0xc] }
 0x12a   : > { %4185 = vmatmul.mubr.msk.bf16.gmra.mrb[8].mxu0 %vm5857_vm2, %v1516_v23  ;;  %v4041_v50 = vpop.f32.mrb[7].mxu1 }
 0x12b   : > { %4188 = vmatprep.mubr.msk.bf16.mxu0 %vm5858_vm1, %v4845_v1  ;;  %v1921_v50 = vld [vmem:[#allocation3 + $0xc] sm:$0x8] }
 0x132   : > { %4189 = vmatmul.mubr.msk.bf16.gmra.mrb[12].mxu0 %vm5857_vm2, %v1524_v29 }
 0x133   : > { %4192 = vmatprep.mubr.msk.bf16.mxu0 %vm5858_vm1, %v4845_v1 }
 0x13a   : > { %4193 = vmatmul.mubr.msk.bf16.gmra.mrb[16].mxu0 %vm5857_vm2, %v1527_v33 }
 0x13b   : > { %4198 = vmatprep.mubr.msk.bf16.mxu0 %vm5858_vm1, %v4845_v1 }
 0x142   : > { %4199 = vmatmul.mubr.msk.bf16.vlgmr.msra.gmra.mrb[0].mxu0 %vm5857_vm2, %v1636_v37  ;;  %v1866_v37 = vld [vmem:[#allocation3 + $0x8] sm:$0x3] }
 0x143   : > { %4202 = vmatprep.mubr.msk.bf16.mxu0 %vm5858_vm1, %v4845_v1 }
 0x14a   : > { %4203 = vmatmul.mubr.msk.bf16.gmra.mrb[4].mxu0 %vm5857_vm2, %v1638_v28 }
 0x14b   : > { %4206 = vmatprep.mubr.msk.bf16.mxu0 %vm5858_vm1, %v4845_v1 }
 0x152   : > { %4207 = vmatmul.mubr.msk.bf16.gmra.mrb[8].mxu0 %vm5857_vm2, %v1640_v32 }
 0x153   : > { %4210 = vmatprep.mubr.msk.bf16.mxu0 %vm5858_vm1, %v4845_v1 }
 0x15a   : > { %4211 = vmatmul.mubr.msk.bf16.gmra.mrb[12].mxu0 %vm5857_vm2, %v1642_v40 }
 0x15b   : > { %4214 = vmatprep.mubr.msk.bf16.mxu0 %vm5858_vm1, %v4845_v1 }
 0x162   : > { %4215 = vmatmul.mubr.msk.bf16.gmra.mrb[16].mxu0 %vm5857_vm2, %v1641_v41  ;;  %vm1888_vm2 = vcmask 59392  }
 0x163   : > { %4418 = vmatprep.mubr.msk.bf16.mxu0 %vm5858_vm1, %v4845_v1  ;;  %vm5262_vm1 = vmand %vm1843_vm6, %vm1864_vm12 }
 0x164   : > { %vm5271_vm6 = vmor %vm5861_vm0, %vm1874_vm15  ;;  %vm1935_vm0 = vcmask 1046532  }
 0x165   : > { %vm5280_vm12 = vmand %vm1888_vm2, %vm1889_vm3 }
 0x166   : > { %vm5286_vm15 = vmand %vm1918_vm8, %vm1919_vm9  ;;  %vm1949_vm9 = vcmask 57344  }
 0x167   : > { %vm5302_vm8 = vmor %vm1934_vm10, %vm1935_vm0 }
 0x168   : > { %vm5311_vm2 = vmor %vm1889_vm3, %vm1896_vm7  ;;  %vm5882_vm3 = vsmask.f32 7938 }
 0x169   : > { %vm5318_vm0 = vmand %vm1820_vm5, %vm1925_vm11 }
 0x16a   : > { %vm5326_vm7 = vmand %vm1820_vm5, %vm5882_vm3 }
 0x215   : > { %v1695_v54 = vpop.f32.mrb[0].mxu0 }
 0x216   : > { %v1749_v56 = vmul.f32 %v5224_v53, %v1695_v54  ;;  %v4200_v57 = vpop.f32.mrb[1].mxu0 }
 0x217   : > { %v1698_v58 = vpop.f32.mrb[2].mxu0 }
 0x218   : > { %v1765_v59 = vadd.f32 %v5229_v55, %v1749_v56  ;;  %v1750_v60 = vmul.f32 %v5224_v53, %v1698_v58  ;;  %v4201_v61 = vpop.f32.mrb[3].mxu0 }
 0x21a   : > { %v1774_v62 = vmax.f32 %v1765_v59, 0.0  ;;  %v1766_v63 = vadd.f32 %v5229_v55, %v1750_v60  ;;  %v1891_v60 = vld [vmem:[#allocation3 + $0xc] sm:$0x7] }
 0x21c   : > { %v3887_v0 = vpack.c.bf16 %v1774_v62, %v1774_v62  ;;  %v1775_v2 = vmax.f32 %v1766_v63, 0.0 }
 0x21d   : > { %v1703_v3 = vpop.f32.mrb[4].mxu0 }
 0x21e   : > { %1821 = vst.msk [vmem:[#allocation2] sm:$0xf] %vm1820_vm5, %v3887_v0  ;;  %v3888_v4 = vpack.c.bf16 %v1775_v2, %v1775_v2  ;;  %v1751_v5 = vmul.f32 %v5224_v53, %v1703_v3  ;;  %v4204_v6 = vpop.f32.mrb[5].mxu0 }
 0x21f   : > { %v1706_v7 = vpop.f32.mrb[6].mxu0 }
 0x220   : > { %1822 = vst.msk [vmem:[#allocation2 + $0x4] sm:$0xf] %vm1820_vm5, %v3888_v4  ;;  %v1767_v8 = vadd.f32 %v5229_v55, %v1751_v5  ;;  %v1752_v9 = vmul.f32 %v5224_v53, %v1706_v7  ;;  %v4205_v10 = vpop.f32.mrb[7].mxu0 }
 0x222   : > { %v1776_v11 = vmax.f32 %v1767_v8, 0.0  ;;  %v1768_v12 = vadd.f32 %v5229_v55, %v1752_v9 }
 0x224   : > { %v3889_v13 = vpack.c.bf16 %v1776_v11, %v1776_v11  ;;  %v1777_v14 = vmax.f32 %v1768_v12, 0.0 }
 0x225   : > { %v1845_v15 = vld [vmem:[#allocation2] sm:$0xf]  ;;  %v1711_v16 = vpop.f32.mrb[8].mxu0 }
 0x226   : > { %v1847_v17 = vshrl.u32 %v1845_v15, 16  ;;  %v1850_v18 = vshll.u32 %v1845_v15, 16  ;;  %1823 = vst.msk [vmem:[#allocation2 + $0x8] sm:$0xf] %vm1820_vm5, %v3889_v13  ;;  %v3890_v19 = vpack.c.bf16 %v1777_v14, %v1777_v14  ;;  %v1753_v20 = vmul.f32 %v5224_v53, %v1711_v16  ;;  %v4208_v21 = vpop.f32.mrb[9].mxu0 }
 0x227   : > { %v1869_v23 = vld [vmem:[#allocation2 + $0x4] sm:$0xf]  ;;  %v1714_v24 = vpop.f32.mrb[10].mxu0 }
 0x228   : > { %v1849_v26 = vrot.slane %v1847_v17, 6  ;;  %v1852_v27 = vrot.slane %v1850_v18, 7  ;;  %v1876_v29 = vrot.slane %v1869_v23, 6  ;;  %1824 = vst.msk [vmem:[#allocation2 + $0xc] sm:$0xf] %vm1820_vm5, %v3890_v19  ;;  %v1769_v30 = vadd.f32 %v5229_v55, %v1753_v20  ;;  %v4209_v31 = vpop.f32.mrb[11].mxu0 }
 0x229   : > { %v1754_v35 = vmul.f32 %v5224_v53, %v1714_v24  ;;  %v2041_v16 = vld [vmem:[#allocation3] sm:$0xf]  ;;  %v1946_v23 = vld [vmem:[#allocation3 + $0x14] sm:$0xf]  ;;  %v1927_v24 = vld [vmem:[#allocation3 + $0x10] sm:$0xf] }
 0x22a   : > { %v1853_v36 = vor.u32 %v1852_v27, %v1849_v26  ;;  %v1778_v38 = vmax.f32 %v1769_v30, 0.0  ;;  %v1886_v28 = vsel %vm5245_vm13, %v1876_v29, %v1885_v22  ;;  %v1877_v42 = vrot.slane %v1876_v29, 4  ;;  %v5307_v20 = vld [vmem:[#allocation3] sm:$0xe]  ;;  %v1983_v18 = vld [vmem:[#allocation3 + $0x1c] sm:$0x3] }
 0x22b   : > { %v1770_v32 = vadd.f32 %v5229_v55, %v1754_v35  ;;  %1887 = vst [vmem:[#allocation3 + $0x8] sm:$0xc] %v1886_v28 }
 0x22c   : > { %v1854_v41 = vrot.slane %v1853_v36, 4  ;;  %v1861_v40 = vsel %vm5253_vm14, %v1853_v36, %v1860_v34  ;;  %v3891_v44 = vpack.c.bf16 %v1778_v38, %v1778_v38 }
 0x22d   : > { %1862 = vst [vmem:[#allocation3 + $0x4] sm:$0xe] %v1861_v40  ;;  %v1870_v46 = vld [vmem:[#allocation2 + $0x8] sm:$0x1]  ;;  %v1894_v49 = vld [vmem:[#allocation2 + $0x8] sm:$0xe] }
 0x22e   : > { %v1779_v51 = vmax.f32 %v1770_v32, 0.0  ;;  %v1719_v52 = vpop.f32.mrb[12].mxu0  ;;  %v1867_v54 = vsel %vm5262_vm1, %v1854_v41, %v1866_v37  ;;  %v1878_v56 = vrot.slane %v1870_v46, 6  ;;  %v1899_v57 = vshll.u32 %v1894_v49, 16  ;;  %1825 = vst.msk [vmem:[#allocation2 + $0x10] sm:$0xf] %vm1820_vm5, %v3891_v44 }
 0x22f   : > { %v1902_v58 = vshrl.u32 %v1894_v49, 16  ;;  %v4212_v61 = vpop.f32.mrb[13].mxu0  ;;  %1868 = vst [vmem:[#allocation3 + $0x8] sm:$0x3] %v1867_v54  ;;  %v1895_v63 = vld [vmem:[#allocation2 + $0xc] sm:$0x1]  ;;  %v4440_v2 = vadd.f32 %v1719_v52, %v5210_v43 }
 0x230   : > { %v3892_v0 = vpack.c.bf16 %v1779_v51, %v1779_v51  ;;  %v1722_v3 = vpop.f32.mrb[14].mxu0  ;;  %v1879_v4 = vsel %vm5271_vm6, %v1877_v42, %v1878_v56  ;;  %v1901_v5 = vrot.slane %v1899_v57, 6  ;;  %v1908_v7 = vshrl.u32 %v1895_v63, 16  ;;  %v1930_v10 = vld [vmem:[#allocation2 + $0xc] sm:$0xe] }
 0x231   : > { %v1904_v6 = vrot.slane %v1902_v58, 5  ;;  %v4213_v8 = vpop.f32.mrb[15].mxu0  ;;  %v1911_v9 = vshll.u32 %v1895_v63, 16  ;;  %v1755_v11 = vmul.f32 %v4440_v2, %v5224_v53  ;;  %v1892_v12 = vsel %vm5280_vm12, %v1879_v4, %v1891_v60  ;;  %v1952_v46 = vld [vmem:[#allocation3 + $0x18] sm:$0x1] }
 0x232   : > { %1826 = vst.msk [vmem:[#allocation2 + $0x14] sm:$0xf] %vm1820_vm5, %v3892_v0  ;;  %v1922_v13 = vsel %vm5286_vm15, %v1901_v5, %v1921_v50  ;;  %v1910_v14 = vrot.slane %v1908_v7, 5  ;;  %1893 = vst [vmem:[#allocation3 + $0xc] sm:$0x7] %v1892_v12  ;;  %v4441_v15 = vadd.f32 %v1722_v3, %v5212_v45  ;;  %v3782_v22 = vrot.slane %v1930_v10, 9 }
 0x233   : > { %v1905_v43 = vor.u32 %v1904_v6, %v1901_v5  ;;  %1923 = vst [vmem:[#allocation3 + $0xc] sm:$0x8] %v1922_v13  ;;  %v1913_v17 = vrot.slane %v1911_v9, 6  ;;  %vm1950_vm6 = vsmask.f32 256  ;;  %v1771_v19 = vadd.f32 %v5229_v55, %v1755_v11 }
 0x234   : > { %v1756_v26 = vmul.f32 %v4441_v15, %v5224_v53  ;;  %v2042_v27 = vld [vmem:[#allocation3 + $0x4] sm:$0xf]  ;;  %vm5333_vm10 = vmand %vm1949_vm9, %vm1950_vm6  ;;  %v2051_v45 = vld [vmem:[%s5849_s4] sm:$0xf] }
 0x235   : > { %v1906_v21 = vrot.slane %v1905_v43, 4  ;;  %v1914_v29 = vor.u32 %v1913_v17, %v1910_v14  ;;  %v1931_v30 = vld [vmem:[#allocation2 + $0x10] sm:$0x3]  ;;  %v1955_v31 = vld [vmem:[#allocation2 + $0x10] sm:$0xc]  ;;  %v1780_v35 = vmax.f32 %v1771_v19, 0.0  ;;  %v5322_v37 = vcombine.low %v2041_v16, %v2042_v27 }
 0x236   : > { %v1727_v36 = vpop.f32.mrb[16].mxu0  ;;  %v1939_v38 = vrot.slane %v1931_v30, 5  ;;  %v1960_v32 = vshrl.u32 %v1955_v31, 16  ;;  %v1963_v41 = vshll.u32 %v1955_v31, 16  ;;  %v1772_v40 = vadd.f32 %v5229_v55, %v1756_v26  ;;  %v1980_v14 = vld [vmem:[#allocation3 + $0x18] sm:$0xe] }
 0x237   : > { %v4216_v42 = vpop.f32.mrb[17].mxu0  ;;  %v3893_v49 = vpack.c.bf16 %v1780_v35, %v1780_v35  ;;  %v1915_v50 = vsel %vm5311_vm2, %v1906_v21, %v1914_v29  ;;  %v4442_v51 = vadd.f32 %v1727_v36, %v5214_v47  ;;  %v3803_v54 = vcombine.low %v5307_v20, %v2042_v27  ;;  %vm5356_vm2 = vmor %vm1925_vm11, %vm1957_vm4  ;;  %v1991_v19 = vld [vmem:[#allocation3 + $0x20] sm:$0x7]  ;;  %v2015_v29 = vld [vmem:[#allocation3 + $0x20] sm:$0x8] }
 0x238   : > { %v1730_v52 = vpop.f32.mrb[18].mxu0  ;;  %v1940_v56 = vsel %vm5302_vm8, %v3782_v22, %v1939_v38  ;;  %v1941_v57 = vrot.slane %v1939_v38, 4  ;;  %v1962_v58 = vrot.slane %v1960_v32, 4  ;;  %v1965_v60 = vrot.slane %v1963_v41, 5 }
 0x239   : > { %v1956_v61 = vld [vmem:[#allocation2 + $0x14] sm:$0x3]  ;;  %v4217_v63 = vpop.f32.mrb[19].mxu0  ;;  %v1947_v0 = vsel %vm5326_vm7, %v1940_v56, %v1946_v23  ;;  %v1986_v4 = vld [vmem:[#allocation2 + $0x14] sm:$0xc]  ;;  %v1928_v47 = vsel %vm5318_vm0, %v1915_v50, %v1927_v24  ;;  %v1781_v8 = vmax.f32 %v1772_v40, 0.0  ;;  %v1757_v43 = vmul.f32 %v4442_v51, %v5224_v53 }
 0x23a   : > { %v1969_v2 = vshll.u32 %v1956_v61, 16  ;;  %v1973_v3 = vshrl.u32 %v1956_v61, 16  ;;  %1827 = vst.msk [vmem:[#allocation2 + $0x18] sm:$0xf] %vm1820_vm5, %v3893_v49  ;;  %1948 = vst [vmem:[#allocation3 + $0x14] sm:$0xf] %v1947_v0  ;;  %v1953_v5 = vsel %vm5333_vm10, %v1941_v57, %v1952_v46  ;;  %v1966_v6 = vor.u32 %v1965_v60, %v1962_v58 }
 0x23b   : > { %v1989_v7 = vsel %vm5245_vm13, %v1986_v4, %v1988_v48  ;;  %1929 = vst [vmem:[#allocation3 + $0x10] sm:$0xf] %v1928_v47  ;;  %v5352_v9 = vld [vmem:[#allocation3 + $0x8] sm:$0xff]   ;;  %1954 = vst [vmem:[#allocation3 + $0x18] sm:$0x1] %v1953_v5  ;;  %v2086_v13 = vshll.u32 %v5322_v37, 16  ;;  %v3894_v15 = vpack.c.bf16 %v1781_v8, %v1781_v8  ;;  %v1773_v20 = vadd.f32 %v5229_v55, %v1757_v43 }
 0x23c   : > { %v1971_v11 = vrot.slane %v1969_v2, 5  ;;  %v1975_v12 = vrot.slane %v1973_v3, 4  ;;  %1990 = vst [vmem:[#allocation3 + $0x1c] sm:$0xc] %v1989_v7  ;;  %v1967_v25 = vrot.slane %v1966_v6, 4  ;;  %v2091_v16 = vshll.u32 %v5352_v9, 16 }
 0x23d   : > { %v2084_v21 = vshrl.u32 %v5322_v37, 16  ;;  %v2088_v22 = vrot.slane %v2086_v13, 1  ;;  %1828 = vst.msk [vmem:[#allocation2 + $0x1c] sm:$0xf] %vm1820_vm5, %v3894_v15  ;;  %v2312_v24 = vrot.slane %v3803_v54, 1  ;;  %v2313_v26 = vrot.slane %v5352_v9, 1 }
 0x23e   : > { %v1976_v17 = vor.u32 %v1975_v12, %v1971_v11  ;;  %v1972_v23 = vsel %vm5356_vm2, %v1967_v25, %v1971_v11  ;;  %v2093_v53 = vrot.slane %v2091_v16, 1  ;;  %v1782_v30 = vmax.f32 %v1773_v20, 0.0  ;;  %v2018_v63 = vld [vmem:[#allocation3 + $0x24] sm:$0xf]  ;;  %v5404_v3 = vld [vmem:[#allocation3 + $0x8] sm:$0xf] }
 0x23f   : > { %v1981_v55 = vsel %vm5253_vm14, %v1972_v23, %v1980_v14  ;;  %v2089_v36 = vor.u32 %v2088_v22, %v2084_v21  ;;  %vm2127_vm4 = vcmask 64512   ;;  %vm5889_vm13 = vcmask 1046528   ;;  %v2035_v6 = vld [vmem:[#allocation3 + $0x28] sm:$0xf]  ;;  %v2738_v7 = vld [vmem:[#allocation3 + $0x4] sm:$0xc] }
 0x240   : > { %v1977_v27 = vrot.slane %v1976_v17, 4  ;;  %1982 = vst [vmem:[#allocation3 + $0x18] sm:$0xe] %v1981_v55  ;;  %v5375_v38 = vsel %vm5889_vm13, %v2312_v24, %v2313_v26  ;;  %vm5890_vm11 = vcmask 1043456   ;;  %v3895_v42 = vpack.c.bf16 %v1782_v30, %v1782_v30  ;;  %vm5893_vm9 = vmmov %vm5889_vm13  ;;  %v2038_v11 = vld [vmem:[#allocation3 + $0x2c] sm:$0x1] }
 0x241   : > { %v1987_v31 = vld [vmem:[#allocation2 + $0x18] sm:$0x7]  ;;  %v1994_v35 = vld [vmem:[#allocation2 + $0x18] sm:$0x8]  ;;  %v2231_v33 = vsel %vm5890_vm11, %v2051_v45, 0  ;;  %v2095_v39 = vshrl.u32 %v5352_v9, 16  ;;  %vm5897_vm13 = vmmov %vm5893_vm9 }
 0x242   : > { %v1984_v32 = vsel %vm5262_vm1, %v1977_v27, %v1983_v18  ;;  %v1992_v41 = vsel %vm5280_vm12, %v1987_v31, %v1991_v19  ;;  %v1999_v40 = vshll.u32 %v1994_v35, 16  ;;  %vm5891_vm14 = vsmask.f32 7424  ;;  %v5383_v48 = vld [vmem:[#allocation3 + $0x10] sm:$0xff]   ;;  %1829 = vst.msk [vmem:[#allocation2 + $0x20] sm:$0xf] %vm1820_vm5, %v3895_v42 }
 0x243   : > { %1985 = vst [vmem:[#allocation3 + $0x1c] sm:$0x3] %v1984_v32  ;;  %1993 = vst [vmem:[#allocation3 + $0x20] sm:$0x7] %v1992_v41  ;;  %v2094_v46 = vsel %vm5891_vm14, %v2089_v36, %v2093_v53  ;;  %vm5892_vm1 = vmmov 0   ;;  %v2099_v59 = vshll.u32 %v5383_v48, 16  ;;  %v2097_v54 = vor.u32 %v2095_v39, %v2093_v53 }
 0x244   : > { %v2016_v49 = vsel %vm5286_vm15, %v1999_v40, %v2015_v29  ;;  %4221 = vmatmul.mubr.msk.bf16.vlgmr.msra.gmra.mrb[8].mxu1 %vm2127_vm4, %v2094_v46  ;;  %v2315_v50 = vrot.slane %v5383_v48, 1  ;;  %vm1996_vm12 = vsmask.f32 4368  ;;  %v1995_v51 = vld [vmem:[#allocation2 + $0x1c] sm:$0x7]  ;;  %v2001_v62 = vshrl.u32 %v1994_v35, 16  ;;  %vm5896_vm2 = vmmov %vm5891_vm14 }
 0x245   : > { %2017 = vst [vmem:[#allocation3 + $0x20] sm:$0x8] %v2016_v49  ;;  %4241 = vmatpush3.bf16.msra.mxu1 %v2231_v33  ;;  %4224 = vmatprep.mubr.msk.bf16.mxu1 %vm5892_vm1, %v4845_v1  ;;  %v2006_v52 = vshrl.u32 %v1995_v51, 16  ;;  %v2101_v56 = vrot.slane %v2099_v59, 1  ;;  %vm2025_vm15 = vcmask 1040384   ;;  %vm2026_vm8 = vcmask 1044484   ;;  %vm5399_vm3 = vmor %vm1950_vm6, %vm1996_vm12 }
 0x246   : > { %4262 = vmatprep.subr.bf16.mxu1 %v4845_v1  ;;  %v5396_v57 = vsel %vm5893_vm9, %v2313_v26, %v2315_v50  ;;  %v2009_v61 = vshll.u32 %v1995_v51, 16  ;;  %v2021_v0 = vld [vmem:[#allocation2 + $0x1c] sm:$0x8]  ;;  %v3783_v47 = vrot.slane %v2001_v62, 11  ;;  %vm2027_vm6 = vmor %vm2025_vm15, %vm2026_vm8  ;;  %v2103_v15 = vshrl.u32 %v5383_v48, 16  ;;  %v5420_v16 = vld [vmem:[#allocation3 + $0xc] sm:$0xff]  }
 0x247   : > { %v2008_v60 = vrot.slane %v2006_v52, 7  ;;  %v2102_v2 = vsel %vm5896_vm2, %v2097_v54, %v2101_v56  ;;  %v3784_v43 = vrot.slane %v2021_v0, 11  ;;  %v5422_v17 = vld [vmem:[#allocation3 + $0x14] sm:$0xff]   ;;  %v3829_v18 = vcombine.low %v2738_v7, %v5404_v3  ;;  %vm5898_vm11 = vmmov %vm5896_vm2  ;;  %v5465_v58 = vld [vmem:[#allocation3 + $0xc] sm:$0xf] }
 0x248   : > { %v2105_v53 = vor.u32 %v2103_v15, %v2101_v56  ;;  %v2746_v26 = vrot.slane %v5420_v16, 2  ;;  %v2748_v27 = vrot.slane %v5422_v17, 2  ;;  %vm5902_vm12 = vmmov %vm5896_vm2  ;;  %vm3177_vm15 = vcmask 1044480  }
 0x249   : > { %v2011_v5 = vor.u32 %v2009_v61, %v2008_v60  ;;  %v2022_v8 = vld [vmem:[#allocation2 + $0x20] sm:$0xf]  ;;  %v2745_v24 = vrot.slane %v3829_v18, 2  ;;  %v3171_v60 = vld [vmem:[#allocation3 + $0x8] sm:$0x8]  ;;  %v5467_v61 = vld [vmem:[#allocation3 + $0x10] sm:$0xff]  }
 0x24a   : > { %v5406_v4 = vld [vmem:[#allocation3 + $0x18] sm:$0xff]   ;;  %v2030_v13 = vrot.slane %v2022_v8, 7  ;;  %v3179_v7 = vrot.slane %v5467_v61, 3  ;;  %v3802_v8 = vld [vmem:[%s5849_s4 + $0x8] sm:$0xf]  ;;  %vm5903_vm8 = vcmask 1043456  }
 0x24b   : > { %v2107_v10 = vshll.u32 %v5406_v4, 16  ;;  %v2012_v12 = vsel %vm5399_vm3, %v3783_v47, %v2011_v5  ;;  %v2317_v25 = vrot.slane %v5406_v4, 1  ;;  %v2111_v35 = vshrl.u32 %v5406_v4, 16  ;;  %vm5905_vm3 = vmmov %vm5903_vm8 }
 0x24c   : > { %4225 = vmatmul.mubr.msk.bf16.gmra.mrb[12].mxu1 %vm2127_vm4, %v2102_v2  ;;  %v2019_v14 = vsel %vm5318_vm0, %v2012_v12, %v2018_v63  ;;  %v2031_v19 = vsel %vm2027_vm6, %v3784_v43, %v2030_v13  ;;  %v2032_v20 = vrot.slane %v2030_v13, 4  ;;  %v5428_v23 = vld [vmem:[#allocation3 + $0x1c] sm:$0xff]   ;;  %vm2744_vm0 = vcmask 1045504  }
 0x24d   : > { %4228 = vmatprep.mubr.msk.bf16.mxu1 %vm5892_vm1, %v4845_v1  ;;  %2020 = vst [vmem:[#allocation3 + $0x24] sm:$0xf] %v2019_v14  ;;  %v2109_v21 = vrot.slane %v2107_v10, 1  ;;  %v5426_v22 = vsel %vm5897_vm13, %v2315_v50, %v2317_v25  ;;  %v2036_v34 = vsel %vm5326_vm7, %v2031_v19, %v2035_v6  ;;  %v2750_v29 = vrot.slane %v5428_v23, 2  ;;  %vm5899_vm7 = vmmov %vm5893_vm9  ;;  %v5471_v2 = vld [vmem:[#allocation3 + $0x18] sm:$0xff]  }
 0x24e   : > { %2037 = vst [vmem:[#allocation3 + $0x28] sm:$0xf] %v2036_v34  ;;  %v2039_v45 = vsel %vm5333_vm10, %v2032_v20, %v2038_v11  ;;  %v5440_v28 = vsel %vm2744_vm0, %v2745_v24, %v2746_v26  ;;  %v5443_v30 = vsel %vm2744_vm0, %v2746_v26, %v2748_v27  ;;  %vm5900_vm10 = vmmov %vm5896_vm2  ;;  %v3855_v63 = vcombine.low %v3171_v60, %v5465_v58 }
 0x24f   : > { %2040 = vst [vmem:[#allocation3 + $0x2c] sm:$0x1] %v2039_v45  ;;  %v2110_v55 = vsel %vm5898_vm11, %v2105_v53, %v2109_v21  ;;  %v5448_v44 = vsel %vm2744_vm0, %v2748_v27, %v2750_v29  ;;  %v2113_v40 = vor.u32 %v2111_v35, %v2109_v21  ;;  %vm5901_vm14 = vmmov %vm5899_vm7  ;;  %v3181_v10 = vrot.slane %v5471_v2, 3 }
 0x250   : > { %v3178_v6 = vrot.slane %v3855_v63, 3  ;;  %v2339_v15 = vsel %vm5903_vm8, %v3802_v8, 0  ;;  %vm5904_vm9 = vmmov %vm5903_vm8  ;;  %v2593_v27 = vshrl.u32 %v5420_v16, 16  ;;  %vm5913_vm8 = vcmask 31744  }
 0x251   : > { %v5491_v13 = vsel %vm3177_vm15, %v3179_v7, %v3181_v10  ;;  %vm5906_vm2 = vmmov %vm5899_vm7 }
 0x252   : > { %v5488_v43 = vsel %vm3177_vm15, %v3178_v6, %v3179_v7  ;;  %vm5907_vm6 = vmmov %vm5906_vm2 }
 0x253   : > { %vm5908_vm13 = vmmov %vm5906_vm2 }
 0x254   : > { %4229 = vmatmul.mubr.msk.bf16.gmra.mrb[16].mxu1 %vm2127_vm4, %v2110_v55  ;;  %v4813_v31 = vld [vmem:[#allocation3 + $0x20] sm:$0xff]   ;;  %vm5909_vm11 = vmmov %vm5906_vm2  ;;  %v2596_v55 = vshll.u32 %v5420_v16, 16 }
 0x255   : > { %4232 = vmatprep.mubr.msk.bf16.mxu1 %vm5892_vm1, %v4845_v1  ;;  %v2115_v36 = vshll.u32 %v4813_v31, 16  ;;  %v4814_v32 = vld [vmem:[#allocation3 + $0x28] ss:$0 sps:$4 sm:$0x11]   ;;  %v2319_v41 = vrot.slane %v4813_v31, 1  ;;  %v2119_v51 = vshrl.u32 %v4813_v31, 16 }
 0x256   : > { %v2321_v42 = vrot.slane %v4814_v32, 1  ;;  %v5451_v46 = vld [vmem:[#allocation3 + $0x24] sm:$0xff]   ;;  %v2123_v59 = vshll.u32 %v4814_v32, 16  ;;  %v4821_v24 = vld [vmem:[#allocation3 + $0x2c] ss:$0 sps:$4 sm:$0x11]  }
 0x257   : > { %v2117_v33 = vrot.slane %v2115_v36, 1  ;;  %v2320_v49 = vsel %vm5899_vm7, %v2317_v25, %v2319_v41  ;;  %v2752_v62 = vrot.slane %v5451_v46, 2  ;;  %v5473_v47 = vld [vmem:[#allocation3 + $0x20] sm:$0xff]   ;;  %v5475_v5 = vld [vmem:[#allocation3 + $0x28] sm:$0xff]   ;;  %v2472_v53 = vrot.slane %v5451_v46, 1  ;;  %vm5910_vm7 = vmmov %vm5906_vm2 }
 0x258   : > { %v2322_v50 = vsel %vm5901_vm14, %v2319_v41, %v2321_v42  ;;  %v2125_v54 = vrot.slane %v2123_v59, 1  ;;  %v3183_v11 = vrot.slane %v5473_v47, 3  ;;  %v3185_v12 = vrot.slane %v5475_v5, 3 }
 0x259   : > { %v2118_v39 = vsel %vm5900_vm10, %v2113_v40, %v2117_v33  ;;  %v2121_v52 = vor.u32 %v2119_v51, %v2117_v33  ;;  %v5463_v56 = vsel %vm2744_vm0, %v2750_v29, %v2752_v62  ;;  %v2474_v26 = vrot.slane %v4821_v24, 1  ;;  %v3334_v33 = vld [vmem:[%s5852_s7] sm:$0x3]  ;;  %v4834_v24 = vld [vmem:[%s401_s28 + $0x10] sm:$0xff]  }
 0x25a   : > { %v5494_v25 = vsel %vm3177_vm15, %v3181_v10, %v3183_v11  ;;  %v5499_v14 = vsel %vm3177_vm15, %v3183_v11, %v3185_v12  ;;  %v2595_v36 = vrot.slane %v2593_v27, 1  ;;  %v2598_v32 = vrot.slane %v2596_v55, 2 }
 0x25b   : > { %v2126_v0 = vsel %vm5902_vm12, %v2121_v52, %v2125_v54  ;;  %v2475_v35 = vsel %vm5910_vm7, %v2472_v53, %v2474_v26  ;;  %vm5911_vm10 = vcmask 1041408   ;;  %v2605_v59 = vshll.u32 %v5422_v17, 16  ;;  %vm5912_vm12 = vmmov %vm5905_vm3  ;;  %v4835_v26 = vld [vmem:[%s401_s28 + $0x18] sm:$0xff]  }
 0x25c   : > { %4233 = vmatmul.mubr.msk.bf16.gmra.mrb[20].mxu1 %vm2127_vm4, %v2118_v39  ;;  %v3376_v42 = vsel %vm5911_vm10, %v3334_v33, 0  ;;  %v2602_v39 = vshrl.u32 %v5422_v17, 16  ;;  %vm2583_vm14 = vsmask.f32 6400  ;;  %v2620_v11 = vshrl.u32 %v5451_v46, 16 }
 0x25d   : > { %4236 = vmatprep.mubr.msk.bf16.mxu1 %vm5892_vm1, %v4845_v1  ;;  %4417 = vmatpush3.bf16.msra.mxu0 %v3376_v42  ;;  %v2607_v60 = vrot.slane %v2605_v59, 2  ;;  %v4829_v33 = vld [vmem:[#allocation3 + $0x30] ss:$0 sps:$4 sm:$0x33]   ;;  %vm3016_vm7 = vsmask.f32 5376 }
 0x25e   : > { %v2604_v54 = vrot.slane %v2602_v39, 1  ;;  %v2907_v42 = vrot.slane %v4829_v33, 2  ;;  %v5758_v33 = vld [vmem:[%s5850_s5] ss:$0 sm:$0xff] }
 0x260   : > { %v2608_v63 = vor.u32 %v2607_v60, %v2604_v54 }
 0x264   : > { %4237 = vmatmul.mubr.msk.bf16.gmra.mrb[24].mxu1 %vm2127_vm4, %v2126_v0  ;;  %v2614_v0 = vshll.u32 %v5428_v23, 16 }
 0x265   : > { %4242 = vmatprep.mubr.msk.bf16.mxu1 %vm5892_vm1, %v4845_v1 }
 0x266   : > { %v2616_v8 = vrot.slane %v2614_v0, 2  ;;  %v3038_v0 = vshll.u32 %v5471_v2, 16 }
 0x26c   : > { %4243 = vmatmul.mubr.msk.bf16.vlgmr.msra.gmra.mrb[8].mxu1 %vm2127_vm4, %v5322_v37  ;;  %v3809_v37 = vld [vmem:[%s5849_s4 + $0xc] sm:$0xf] }
 0x26d   : > { %4263 = vmatpush3.bf16.msra.mxu1 %v2339_v15  ;;  %4246 = vmatprep.mubr.msk.bf16.mxu1 %vm5892_vm1, %v4845_v1  ;;  %v2623_v15 = vshll.u32 %v5451_v46, 16 }
 0x26e   : > { %4284 = vmatprep.subr.bf16.mxu1 %v4845_v1 }
 0x274   : > { %4247 = vmatmul.mubr.msk.bf16.gmra.mrb[12].mxu1 %vm2127_vm4, %v5352_v9  ;;  %v2492_v9 = vsel %vm5904_vm9, %v3809_v37, 0  ;;  %vm5914_vm9 = vmmov %vm5905_vm3 }
 0x275   : > { %4250 = vmatprep.mubr.msk.bf16.mxu1 %vm5892_vm1, %v4845_v1 }
 0x27c   : > { %4251 = vmatmul.mubr.msk.bf16.gmra.mrb[16].mxu1 %vm2127_vm4, %v5383_v48 }
 0x27d   : > { %4254 = vmatprep.mubr.msk.bf16.mxu1 %vm5892_vm1, %v4845_v1 }
 0x284   : > { %4255 = vmatmul.mubr.msk.bf16.gmra.mrb[20].mxu1 %vm2127_vm4, %v5406_v4  ;;  %v3821_v4 = vld [vmem:[%s5849_s4 + $0x10] sm:$0xf] }
 0x285   : > { %4258 = vmatprep.mubr.msk.bf16.mxu1 %vm5892_vm1, %v4845_v1  ;;  %v2653_v19 = vsel %vm5905_vm3, %v3821_v4, 0  ;;  %vm5915_vm3 = vmmov %vm5913_vm8 }
 0x28c   : > { %4259 = vmatmul.mubr.msk.bf16.gmra.mrb[24].mxu1 %vm2127_vm4, %v4813_v31 }
 0x28d   : > { %4264 = vmatprep.mubr.msk.bf16.mxu1 %vm5892_vm1, %v4845_v1 }
 0x294   : > { %4265 = vmatmul.mubr.msk.bf16.vlgmr.msra.gmra.mrb[8].mxu1 %vm2127_vm4, %v5375_v38  ;;  %v2424_v38 = vld [vmem:[#allocation3 + $0x4] sm:$0xe] }
 0x295   : > { %4285 = vmatpush3.bf16.msra.mxu1 %v2492_v9  ;;  %4268 = vmatprep.mubr.msk.bf16.mxu1 %vm5892_vm1, %v4845_v1  ;;  %v3810_v48 = vcombine.low %v2424_v38, %v5404_v3  ;;  %v2468_v3 = vrot.slane %v5422_v17, 1  ;;  %v2611_v17 = vshrl.u32 %v5428_v23, 16  ;;  %v2622_v9 = vrot.slane %v2620_v11, 1  ;;  %v4822_v38 = vld [vmem:[#allocation3 + $0x2c] ss:$0 sps:$4 sm:$0x33]  }
 0x296   : > { %4306 = vmatprep.subr.bf16.mxu1 %v4845_v1  ;;  %v2632_v4 = vshll.u32 %v4822_v38, 16  ;;  %v3040_v11 = vrot.slane %v3038_v0, 3 }
 0x297   : > { %v2465_v18 = vrot.slane %v3810_v48, 1  ;;  %v2585_v29 = vshrl.u32 %v3810_v48, 16  ;;  %v2588_v31 = vshll.u32 %v3810_v48, 16  ;;  %v2613_v7 = vrot.slane %v2611_v17, 1  ;;  %v3854_v17 = vld [vmem:[%s5849_s4 + $0x20] sm:$0xf] }
 0x299   : > { %v2587_v41 = vrot.slane %v2585_v29, 1  ;;  %v2590_v40 = vrot.slane %v2588_v31, 2  ;;  %v2617_v10 = vor.u32 %v2616_v8, %v2613_v7  ;;  %v2899_v29 = vrot.slane %v5467_v61, 2 }
 0x29b   : > { %v2618_v37 = vsel %vm2583_vm14, %v2608_v63, %v2617_v10 }
 0x29c   : > { %4269 = vmatmul.mubr.msk.bf16.gmra.mrb[12].mxu1 %vm2127_vm4, %v5396_v57  ;;  %v2466_v57 = vrot.slane %v5420_v16, 1  ;;  %v2599_v16 = vor.u32 %v2598_v32, %v2595_v36  ;;  %v2903_v36 = vrot.slane %v5473_v47, 2 }
 0x29d   : > { %4272 = vmatprep.mubr.msk.bf16.mxu1 %vm5892_vm1, %v4845_v1 }
 0x29e   : > { %v2467_v20 = vsel %vm5906_vm2, %v2465_v18, %v2466_v57  ;;  %v2469_v21 = vsel %vm5907_vm6, %v2466_v57, %v2468_v3  ;;  %v2609_v6 = vsel %vm2583_vm14, %v2599_v16, %v2608_v63  ;;  %v2629_v57 = vshrl.u32 %v4822_v38, 16  ;;  %vm5916_vm2 = vmmov %vm5915_vm3 }
 0x29f   : > { %vm5917_vm6 = vmmov %vm5916_vm2 }
 0x2a4   : > { %4273 = vmatmul.mubr.msk.bf16.gmra.mrb[16].mxu1 %vm2127_vm4, %v5426_v22  ;;  %v2470_v22 = vrot.slane %v5428_v23, 1  ;;  %v2625_v23 = vrot.slane %v2623_v15, 2 }
 0x2a5   : > { %4276 = vmatprep.mubr.msk.bf16.mxu1 %vm5892_vm1, %v4845_v1 }
 0x2a6   : > { %v2471_v34 = vsel %vm5908_vm13, %v2468_v3, %v2470_v22  ;;  %v2473_v45 = vsel %vm5909_vm11, %v2470_v22, %v2472_v53  ;;  %v2626_v48 = vor.u32 %v2625_v23, %v2622_v9  ;;  %v3835_v53 = vld [vmem:[%s5849_s4 + $0x18] sm:$0xf]  ;;  %vm5918_vm13 = vmmov %vm5916_vm2  ;;  %v3047_v9 = vshll.u32 %v5473_v47, 16 }
 0x2a7   : > { %vm5919_vm11 = vmmov %vm5914_vm9 }
 0x2a8   : > { %v2627_v18 = vsel %vm2583_vm14, %v2617_v10, %v2626_v48 }
 0x2ac   : > { %4277 = vmatmul.mubr.msk.bf16.gmra.mrb[20].mxu1 %vm2127_vm4, %v2320_v49  ;;  %v3828_v49 = vld [vmem:[%s5849_s4 + $0x14] sm:$0xf] }
 0x2ad   : > { %4280 = vmatprep.mubr.msk.bf16.mxu1 %vm5892_vm1, %v4845_v1  ;;  %v2772_v51 = vsel %vm5912_vm12, %v3828_v49, 0  ;;  %v3029_v49 = vshll.u32 %v5467_v61, 16 }
 0x2b4   : > { %4281 = vmatmul.mubr.msk.bf16.gmra.mrb[24].mxu1 %vm2127_vm4, %v2322_v50  ;;  %v2591_v50 = vor.u32 %v2590_v40, %v2587_v41  ;;  %v2905_v41 = vrot.slane %v5475_v5, 2 }
 0x2b5   : > { %4286 = vmatprep.mubr.msk.bf16.mxu1 %vm5892_vm1, %v4845_v1 }
 0x2b6   : > { %v2600_v52 = vsel %vm2583_vm14, %v2591_v50, %v2599_v16  ;;  %v2906_v40 = vsel %vm2744_vm0, %v2903_v36, %v2905_v41  ;;  %v3026_v16 = vshrl.u32 %v5467_v61, 16  ;;  %v2908_v50 = vsel %vm2744_vm0, %v2905_v41, %v2907_v42 }
 0x2b7   : > { %v3035_v61 = vshrl.u32 %v5471_v2, 16 }
 0x2b9   : > { %v3037_v10 = vrot.slane %v3035_v61, 2 }
 0x2bb   : > { %v3041_v15 = vor.u32 %v3040_v11, %v3037_v10 }
 0x2bc   : > { %4287 = vmatmul.mubr.msk.bf16.vlgmr.msra.gmra.mrb[8].mxu1 %vm2127_vm4, %v2467_v20  ;;  %v2634_v20 = vrot.slane %v2632_v4, 2  ;;  %v3056_v4 = vshll.u32 %v5475_v5, 16 }
 0x2bd   : > { %4307 = vmatpush3.bf16.msra.mxu1 %v2653_v19  ;;  %4290 = vmatprep.mubr.msk.bf16.mxu1 %vm5892_vm1, %v4845_v1  ;;  %v2631_v19 = vrot.slane %v2629_v57, 1  ;;  %v3053_v57 = vshrl.u32 %v5475_v5, 16 }
 0x2be   : > { %4328 = vmatprep.subr.bf16.mxu1 %v4845_v1 }
 0x2bf   : > { %v2635_v3 = vor.u32 %v2634_v20, %v2631_v19  ;;  %v3055_v19 = vrot.slane %v3053_v57, 2  ;;  %v3058_v20 = vrot.slane %v3056_v4, 3 }
 0x2c1   : > { %v2636_v22 = vsel %vm2583_vm14, %v2626_v48, %v2635_v3  ;;  %v4830_v3 = vld [vmem:[#allocation3 + $0x30] ss:$0 sps:$4 sm:$0x77]  }
 0x2c4   : > { %4291 = vmatmul.mubr.msk.bf16.gmra.mrb[12].mxu1 %vm2127_vm4, %v2469_v21  ;;  %v4831_v21 = vld [vmem:[%s401_s28] sm:$0xff]  }
 0x2c5   : > { %4294 = vmatprep.mubr.msk.bf16.mxu1 %vm5892_vm1, %v4845_v1  ;;  %4419 = vmatmul.mubr.msk.bf16.vlgmr.msra.gmra.mrb[20].mxu0 %vm5913_vm8, %v4831_v21  ;;  %v3062_v21 = vshrl.u32 %v4830_v3, 16 }
 0x2c6   : > { %4422 = vmatprep.mubr.msk.bf16.mxu0 %vm5892_vm1, %v4845_v1 }
 0x2cc   : > { %4295 = vmatmul.mubr.msk.bf16.gmra.mrb[16].mxu1 %vm2127_vm4, %v2471_v34  ;;  %v4833_v34 = vld [vmem:[%s401_s28 + $0x8] sm:$0xff]  }
 0x2cd   : > { %4298 = vmatprep.mubr.msk.bf16.mxu1 %vm5892_vm1, %v4845_v1  ;;  %4423 = vmatmul.mubr.msk.bf16.gmra.mrb[24].mxu0 %vm5915_vm3, %v4833_v34 }
 0x2ce   : > { %4426 = vmatprep.mubr.msk.bf16.mxu0 %vm5892_vm1, %v4845_v1 }
 0x2d4   : > { %4299 = vmatmul.mubr.msk.bf16.gmra.mrb[20].mxu1 %vm2127_vm4, %v2473_v45  ;;  %v2925_v45 = vsel %vm5914_vm9, %v3835_v53, 0  ;;  %v3064_v53 = vrot.slane %v3062_v21, 2 }
 0x2d5   : > { %4302 = vmatprep.mubr.msk.bf16.mxu1 %vm5892_vm1, %v4845_v1  ;;  %4427 = vmatmul.mubr.msk.bf16.gmra.mrb[28].mxu0 %vm5916_vm2, %v4834_v24 }
 0x2d6   : > { %4430 = vmatprep.mubr.msk.bf16.mxu0 %vm5892_vm1, %v4845_v1 }
 0x2dc   : > { %4303 = vmatmul.mubr.msk.bf16.gmra.mrb[24].mxu1 %vm2127_vm4, %v2475_v35 }
 0x2dd   : > { %4308 = vmatprep.mubr.msk.bf16.mxu1 %vm5892_vm1, %v4845_v1  ;;  %4431 = vmatmul.mubr.msk.bf16.gmra.mrb[32].mxu0 %vm5917_vm6, %v4835_v26 }
 0x2de   : > { %4434 = vmatprep.mubr.msk.bf16.mxu0 %vm5892_vm1, %v4845_v1 }
 0x2e4   : > { %4309 = vmatmul.mubr.msk.bf16.vlgmr.msra.gmra.mrb[8].mxu1 %vm2127_vm4, %v2600_v52  ;;  %v3031_v52 = vrot.slane %v3029_v49, 3 }
 0x2e5   : > { %4329 = vmatpush3.bf16.msra.mxu1 %v2772_v51  ;;  %4312 = vmatprep.mubr.msk.bf16.mxu1 %vm5892_vm1, %v4845_v1  ;;  %v3028_v51 = vrot.slane %v3026_v16, 2  ;;  %v5763_v16 = vld [vmem:[%s5851_s6] ss:$0 sm:$0xff] }
 0x2e6   : > { %4350 = vmatprep.subr.bf16.mxu1 %v4845_v1 }
 0x2e7   : > { %v3032_v63 = vor.u32 %v3031_v52, %v3028_v51 }
 0x2ec   : > { %4313 = vmatmul.mubr.msk.bf16.gmra.mrb[12].mxu1 %vm2127_vm4, %v2609_v6 }
 0x2ed   : > { %4316 = vmatprep.mubr.msk.bf16.mxu1 %vm5892_vm1, %v4845_v1 }
 0x2f4   : > { %4317 = vmatmul.mubr.msk.bf16.gmra.mrb[16].mxu1 %vm2127_vm4, %v2618_v37  ;;  %v3044_v37 = vshrl.u32 %v5473_v47, 16  ;;  %v3059_v47 = vor.u32 %v3058_v20, %v3055_v19 }
 0x2f5   : > { %4320 = vmatprep.mubr.msk.bf16.mxu1 %vm5892_vm1, %v4845_v1 }
 0x2f6   : > { %v3046_v23 = vrot.slane %v3044_v37, 2 }
 0x2fc   : > { %4321 = vmatmul.mubr.msk.bf16.gmra.mrb[20].mxu1 %vm2127_vm4, %v2627_v18 }
 0x2fd   : > { %4324 = vmatprep.mubr.msk.bf16.mxu1 %vm5892_vm1, %v4845_v1 }
 0x304   : > { %4325 = vmatmul.mubr.msk.bf16.gmra.mrb[24].mxu1 %vm2127_vm4, %v2636_v22  ;;  %v3065_v22 = vshll.u32 %v4830_v3, 16 }
 0x305   : > { %4330 = vmatprep.mubr.msk.bf16.mxu1 %vm5892_vm1, %v4845_v1 }
 0x30c   : > { %4331 = vmatmul.mubr.msk.bf16.vlgmr.msra.gmra.mrb[8].mxu1 %vm2127_vm4, %v5440_v28  ;;  %v4836_v28 = vld [vmem:[%s401_s28 + $0x20] sm:$0xff]  }
 0x30d   : > { %4351 = vmatpush3.bf16.msra.mxu1 %v2925_v45  ;;  %4334 = vmatprep.mubr.msk.bf16.mxu1 %vm5892_vm1, %v4845_v1  ;;  %v3067_v45 = vrot.slane %v3065_v22, 3 }
 0x30e   : > { %4372 = vmatprep.subr.bf16.mxu1 %v4845_v1  ;;  %4435 = vmatmul.mubr.msk.bf16.gmra.mrb[36].mxu0 %vm5918_vm13, %v4836_v28 }
 0x30f   : > { %v3068_v24 = vor.u32 %v3067_v45, %v3064_v53 }
 0x311   : > { %v3069_v26 = vsel %vm3016_vm7, %v3059_v47, %v3068_v24 }
 0x314   : > { %4335 = vmatmul.mubr.msk.bf16.gmra.mrb[12].mxu1 %vm2127_vm4, %v5443_v30  ;;  %v2754_v30 = vrot.slane %v4822_v38, 2  ;;  %v3049_v38 = vrot.slane %v3047_v9, 3 }
 0x315   : > { %4338 = vmatprep.mubr.msk.bf16.mxu1 %vm5892_vm1, %v4845_v1 }
 0x316   : > { %v2755_v27 = vsel %vm2744_vm0, %v2752_v62, %v2754_v30  ;;  %v2901_v62 = vrot.slane %v5471_v2, 2  ;;  %v3042_v2 = vsel %vm3016_vm7, %v3032_v63, %v3041_v15  ;;  %v3050_v48 = vor.u32 %v3049_v38, %v3046_v23 }
 0x318   : > { %v2904_v32 = vsel %vm2744_vm0, %v2901_v62, %v2903_v36  ;;  %v3051_v18 = vsel %vm3016_vm7, %v3041_v15, %v3050_v48  ;;  %v3060_v34 = vsel %vm3016_vm7, %v3050_v48, %v3059_v47 }
 0x31c   : > { %4339 = vmatmul.mubr.msk.bf16.gmra.mrb[16].mxu1 %vm2127_vm4, %v5448_v44  ;;  %v2857_v44 = vld [vmem:[#allocation3 + $0x8] sm:$0xc] }
 0x31d   : > { %4342 = vmatprep.mubr.msk.bf16.mxu1 %vm5892_vm1, %v4845_v1  ;;  %v3836_v55 = vcombine.low %v2857_v44, %v5465_v58  ;;  %v2902_v58 = vsel %vm2744_vm0, %v2899_v29, %v2901_v62 }
 0x31f   : > { %v2898_v31 = vrot.slane %v3836_v55, 2  ;;  %v3018_v39 = vshrl.u32 %v3836_v55, 16  ;;  %v3021_v59 = vshll.u32 %v3836_v55, 16 }
 0x321   : > { %v2900_v46 = vsel %vm2744_vm0, %v2898_v31, %v2899_v29  ;;  %v3020_v54 = vrot.slane %v3018_v39, 2  ;;  %v3023_v60 = vrot.slane %v3021_v59, 3  ;;  %vm5920_vm0 = vmmov %vm5914_vm9 }
 0x322   : > { %v3205_v7 = vsel %vm5920_vm0, %v3854_v17, 0 }
 0x323   : > { %v3024_v6 = vor.u32 %v3023_v60, %v3020_v54  ;;  %v5772_v60 = vld [vmem:[%s5854_s9] ss:$0 sm:$0xff] }
 0x324   : > { %4343 = vmatmul.mubr.msk.bf16.gmra.mrb[20].mxu1 %vm2127_vm4, %v5463_v56  ;;  %v3847_v56 = vld [vmem:[%s5849_s4 + $0x1c] sm:$0xf] }
 0x325   : > { %4346 = vmatprep.mubr.msk.bf16.mxu1 %vm5892_vm1, %v4845_v1  ;;  %v3086_v35 = vsel %vm5919_vm11, %v3847_v56, 0  ;;  %v3033_v8 = vsel %vm3016_vm7, %v3024_v6, %v3032_v63 }
 0x32c   : > { %4347 = vmatmul.mubr.msk.bf16.gmra.mrb[24].mxu1 %vm2127_vm4, %v2755_v27 }
 0x32d   : > { %4352 = vmatprep.mubr.msk.bf16.mxu1 %vm5892_vm1, %v4845_v1 }
 0x334   : > { %4353 = vmatmul.mubr.msk.bf16.vlgmr.msra.gmra.mrb[8].mxu1 %vm2127_vm4, %v2900_v46 }
 0x335   : > { %4373 = vmatpush3.bf16.msra.mxu1 %v3086_v35  ;;  %4356 = vmatprep.mubr.msk.bf16.mxu1 %vm5892_vm1, %v4845_v1 }
 0x336   : > { %4394 = vmatprep.subr.bf16.mxu1 %v4845_v1 }
 0x33c   : > { %4357 = vmatmul.mubr.msk.bf16.gmra.mrb[12].mxu1 %vm2127_vm4, %v2902_v58 }
 0x33d   : > { %4360 = vmatprep.mubr.msk.bf16.mxu1 %vm5892_vm1, %v4845_v1 }
 0x344   : > { %4361 = vmatmul.mubr.msk.bf16.gmra.mrb[16].mxu1 %vm2127_vm4, %v2904_v32 }
 0x345   : > { %4364 = vmatprep.mubr.msk.bf16.mxu1 %vm5892_vm1, %v4845_v1 }
 0x34c   : > { %4365 = vmatmul.mubr.msk.bf16.gmra.mrb[20].mxu1 %vm2127_vm4, %v2906_v40  ;;  %v5753_v40 = vld [vmem:[%s5853_s8] ss:$0 sm:$0xff] }
 0x34d   : > { %4368 = vmatprep.mubr.msk.bf16.mxu1 %vm5892_vm1, %v4845_v1 }
 0x354   : > { %4369 = vmatmul.mubr.msk.bf16.gmra.mrb[24].mxu1 %vm2127_vm4, %v2908_v50 }
 0x355   : > { %4374 = vmatprep.mubr.msk.bf16.mxu1 %vm5892_vm1, %v4845_v1 }
 0x35c   : > { %4375 = vmatmul.mubr.msk.bf16.vlgmr.msra.gmra.mrb[8].mxu1 %vm2127_vm4, %v3033_v8 }
 0x35d   : > { %4395 = vmatpush3.bf16.msra.mxu1 %v3205_v7  ;;  %4378 = vmatprep.mubr.msk.bf16.mxu1 %vm5892_vm1, %v4845_v1 }
 0x364   : > { %4379 = vmatmul.mubr.msk.bf16.gmra.mrb[12].mxu1 %vm2127_vm4, %v3042_v2 }
 0x365   : > { %4382 = vmatprep.mubr.msk.bf16.mxu1 %vm5892_vm1, %v4845_v1 }
 0x36c   : > { %4383 = vmatmul.mubr.msk.bf16.gmra.mrb[16].mxu1 %vm2127_vm4, %v3051_v18 }
 0x36d   : > { %4386 = vmatprep.mubr.msk.bf16.mxu1 %vm5892_vm1, %v4845_v1 }
 0x374   : > { %4387 = vmatmul.mubr.msk.bf16.gmra.mrb[20].mxu1 %vm2127_vm4, %v3060_v34 }
 0x375   : > { %4390 = vmatprep.mubr.msk.bf16.mxu1 %vm5892_vm1, %v4845_v1 }
 0x37c   : > { %4391 = vmatmul.mubr.msk.bf16.gmra.mrb[24].mxu1 %vm2127_vm4, %v3069_v26 }
 0x37d   : > { %4396 = vmatprep.mubr.msk.bf16.mxu1 %vm5892_vm1, %v4845_v1 }
 0x384   : > { %4397 = vmatmul.mubr.msk.bf16.vlgmr.msra.gmra.mrb[8].mxu1 %vm2127_vm4, %v5488_v43  ;;  %v3187_v43 = vrot.slane %v4830_v3, 3 }
 0x385   : > { %4400 = vmatprep.mubr.msk.bf16.mxu1 %vm5892_vm1, %v4845_v1 }
 0x38c   : > { %4401 = vmatmul.mubr.msk.bf16.gmra.mrb[12].mxu1 %vm2127_vm4, %v5491_v13  ;;  %v3188_v13 = vsel %vm3177_vm15, %v3185_v12, %v3187_v43 }
 0x38d   : > { %4404 = vmatprep.mubr.msk.bf16.mxu1 %vm5892_vm1, %v4845_v1 }
 0x394   : > { %4405 = vmatmul.mubr.msk.bf16.gmra.mrb[16].mxu1 %vm2127_vm4, %v5494_v25 }
 0x395   : > { %4408 = vmatprep.mubr.msk.bf16.mxu1 %vm5892_vm1, %v4845_v1 }
 0x398   : > { %v3412_v28 = vpop.f32.mrb[20].mxu0 }
 0x399   : > { %v4420_v30 = vpop.f32.mrb[21].mxu0  ;;  %v3458_v49 = vmul.f32 %v5753_v40, %v3412_v28 }
 0x39a   : > { %v3415_v27 = vpop.f32.mrb[22].mxu0 }
 0x39b   : > { %v4421_v25 = vpop.f32.mrb[23].mxu0  ;;  %v3459_v17 = vmul.f32 %v5753_v40, %v3415_v27 }
 0x39c   : > { %4409 = vmatmul.mubr.msk.bf16.gmra.mrb[20].mxu1 %vm2127_vm4, %v5499_v14 }
 0x39d   : > { %4412 = vmatprep.mubr.msk.bf16.mxu1 %vm5892_vm1, %v4845_v1 }
 0x3a0   : > { %v3420_v44 = vpop.f32.mrb[24].mxu0 }
 0x3a1   : > { %v4424_v55 = vpop.f32.mrb[25].mxu0  ;;  %v3460_v11 = vmul.f32 %v5753_v40, %v3420_v44 }
 0x3a2   : > { %v3423_v29 = vpop.f32.mrb[26].mxu0 }
 0x3a3   : > { %v4425_v56 = vpop.f32.mrb[27].mxu0  ;;  %v3461_v19 = vmul.f32 %v5753_v40, %v3423_v29 }
 0x3a4   : > { %4413 = vmatmul.mubr.msk.bf16.gmra.mrb[24].mxu1 %vm2127_vm4, %v3188_v13 }
 0x3a8   : > { %v3428_v31 = vpop.f32.mrb[28].mxu0 }
 0x3a9   : > { %v4428_v14 = vpop.f32.mrb[29].mxu0  ;;  %v3462_v53 = vmul.f32 %v5753_v40, %v3428_v31 }
 0x3aa   : > { %v5740_v35 = vpop.f32.mrb[30].mxu0 }
 0x3ab   : > { %v4429_v1 = vpop.f32.mrb[31].mxu0  ;;  %v3463_v55 = vmul.f32 %v5753_v40, %v5740_v35 }
 0x3b0   : > { %v5742_v46 = vpop.f32.mrb[32].mxu0 }
 0x3b1   : > { %v4432_v5 = vpop.f32.mrb[33].mxu0 }
 0x3b2   : > { %v5744_v62 = vpop.f32.mrb[34].mxu0 }
 0x3b3   : > { %v4433_v12 = vpop.f32.mrb[35].mxu0 }
 0x3b4   : > { %v3464_v12 = vmul.f32 %v5753_v40, %v5742_v46 }
 0x3e1   : > { %v5746_v58 = vpop.f32.mrb[36].mxu0 }
 0x3e2   : > { %v4436_v36 = vpop.f32.mrb[37].mxu0 }
 0x3e3   : > { %v5748_v32 = vpop.f32.mrb[38].mxu0 }
 0x3e4   : > { %v4437_v41 = vpop.f32.mrb[39].mxu0 }
 0x457   : > { %v3241_v42 = vpop.f32.mrb[8].mxu1 }
 0x458   : > { %v3297_v39 = vmul.f32 %v5758_v33, %v3241_v42  ;;  %v4398_v59 = vpop.f32.mrb[9].mxu1 }
 0x459   : > { %v3244_v50 = vpop.f32.mrb[10].mxu1 }
 0x45a   : > { %v3314_v51 = vadd.f32 %v5763_v16, %v3297_v39  ;;  %v3298_v52 = vmul.f32 %v5758_v33, %v3244_v50  ;;  %v4399_v54 = vpop.f32.mrb[11].mxu1 }
 0x45b   : > { %v3465_v54 = vmul.f32 %v5753_v40, %v5744_v62 }
 0x45c   : > { %v3468_v63 = vadd.f32 %v3458_v49, %v3314_v51  ;;  %v3315_v61 = vadd.f32 %v5763_v16, %v3298_v52 }
 0x45e   : > { %v3485_v0 = vadd.f32 %v5772_v60, %v3468_v63  ;;  %v3469_v6 = vadd.f32 %v3459_v17, %v3315_v61 }
 0x45f   : > { %v3249_v7 = vpop.f32.mrb[12].mxu1 }
 0x460   : > { %v3495_v8 = vmax.f32 %v3485_v0, 0.0  ;;  %v3486_v10 = vadd.f32 %v5772_v60, %v3469_v6  ;;  %v3299_v15 = vmul.f32 %v5758_v33, %v3249_v7  ;;  %v4402_v37 = vpop.f32.mrb[13].mxu1  ;;  %v3466_v7 = vmul.f32 %v5753_v40, %v5746_v58 }
 0x461   : > { %v3252_v9 = vpop.f32.mrb[14].mxu1  ;;  %v3467_v58 = vmul.f32 %v5753_v40, %v5748_v32 }
 0x462   : > { %v3896_v2 = vpack.c.bf16 %v3495_v8, %v3495_v8  ;;  %v3496_v23 = vmax.f32 %v3486_v10, 0.0  ;;  %v3316_v38 = vadd.f32 %v5763_v16, %v3299_v15  ;;  %v3300_v48 = vmul.f32 %v5758_v33, %v3252_v9  ;;  %v4403_v57 = vpop.f32.mrb[15].mxu1 }
 0x464   : > { %3545 = vst.msk [vmem:[%s5785_s29] sm:$0xf] %vm1820_vm5, %v3896_v2  ;;  %v3897_v4 = vpack.c.bf16 %v3496_v23, %v3496_v23  ;;  %v3470_v18 = vadd.f32 %v3460_v11, %v3316_v38  ;;  %v3317_v20 = vadd.f32 %v5763_v16, %v3300_v48 }
 0x466   : > { %3546 = vst.msk [vmem:[%s5785_s29 + $0x4] sm:$0xf] %vm1820_vm5, %v3897_v4  ;;  %v3487_v3 = vadd.f32 %v5772_v60, %v3470_v18  ;;  %v3471_v47 = vadd.f32 %v3461_v19, %v3317_v20 }
 0x467   : > { %v3257_v21 = vpop.f32.mrb[16].mxu1 }
 0x468   : > { %v3497_v22 = vmax.f32 %v3487_v3, 0.0  ;;  %v3488_v34 = vadd.f32 %v5772_v60, %v3471_v47  ;;  %v3301_v45 = vmul.f32 %v5758_v33, %v3257_v21  ;;  %v4406_v24 = vpop.f32.mrb[17].mxu1 }
 0x469   : > { %v3260_v26 = vpop.f32.mrb[18].mxu1 }
 0x46a   : > { %v3898_v43 = vpack.c.bf16 %v3497_v22, %v3497_v22  ;;  %v3498_v13 = vmax.f32 %v3488_v34, 0.0  ;;  %v3318_v28 = vadd.f32 %v5763_v16, %v3301_v45  ;;  %v3302_v30 = vmul.f32 %v5758_v33, %v3260_v26  ;;  %v4407_v27 = vpop.f32.mrb[19].mxu1 }
 0x46c   : > { %3547 = vst.msk [vmem:[%s5785_s29 + $0x8] sm:$0xf] %vm1820_vm5, %v3898_v43  ;;  %v3899_v25 = vpack.c.bf16 %v3498_v13, %v3498_v13  ;;  %v3472_v44 = vadd.f32 %v3462_v53, %v3318_v28  ;;  %v3319_v29 = vadd.f32 %v5763_v16, %v3302_v30 }
 0x46e   : > { %3548 = vst.msk [vmem:[%s5785_s29 + $0xc] sm:$0xf] %vm1820_vm5, %v3899_v25  ;;  %v3489_v56 = vadd.f32 %v5772_v60, %v3472_v44  ;;  %v3473_v31 = vadd.f32 %v3463_v55, %v3319_v29 }
 0x46f   : > { %v3265_v14 = vpop.f32.mrb[20].mxu1 }
 0x470   : > { %v3499_v1 = vmax.f32 %v3489_v56, 0.0  ;;  %v3490_v5 = vadd.f32 %v5772_v60, %v3473_v31  ;;  %v3303_v36 = vmul.f32 %v5758_v33, %v3265_v14  ;;  %v4410_v41 = vpop.f32.mrb[21].mxu1 }
 0x471   : > { %v3268_v35 = vpop.f32.mrb[22].mxu1 }
 0x472   : > { %v3900_v42 = vpack.c.bf16 %v3499_v1, %v3499_v1  ;;  %v3500_v49 = vmax.f32 %v3490_v5, 0.0  ;;  %v3320_v39 = vadd.f32 %v5763_v16, %v3303_v36  ;;  %v3304_v59 = vmul.f32 %v5758_v33, %v3268_v35  ;;  %v4411_v50 = vpop.f32.mrb[23].mxu1 }
 0x474   : > { %3549 = vst.msk [vmem:[%s5785_s29 + $0x10] sm:$0xf] %vm1820_vm5, %v3900_v42  ;;  %v3901_v51 = vpack.c.bf16 %v3500_v49, %v3500_v49  ;;  %v3474_v52 = vadd.f32 %v3464_v12, %v3320_v39  ;;  %v3321_v46 = vadd.f32 %v5763_v16, %v3304_v59 }
 0x476   : > { %3550 = vst.msk [vmem:[%s5785_s29 + $0x14] sm:$0xf] %vm1820_vm5, %v3901_v51  ;;  %v3491_v63 = vadd.f32 %v5772_v60, %v3474_v52  ;;  %v3475_v17 = vadd.f32 %v3465_v54, %v3321_v46 }
 0x477   : > { %v3273_v61 = vpop.f32.mrb[24].mxu1 }
 0x478   : > { %v3501_v0 = vmax.f32 %v3491_v63, 0.0  ;;  %v3492_v6 = vadd.f32 %v5772_v60, %v3475_v17  ;;  %v3305_v8 = vmul.f32 %v5758_v33, %v3273_v61  ;;  %v4414_v10 = vpop.f32.mrb[25].mxu1 }
 0x479   : > { %v3276_v62 = vpop.f32.mrb[26].mxu1 }
 0x47a   : > { %v3902_v11 = vpack.c.bf16 %v3501_v0, %v3501_v0  ;;  %v3502_v15 = vmax.f32 %v3492_v6, 0.0  ;;  %v3322_v37 = vadd.f32 %v5763_v16, %v3305_v8  ;;  %v3306_v9 = vmul.f32 %v5758_v33, %v3276_v62  ;;  %v4415_v2 = vpop.f32.mrb[27].mxu1 }
 0x47c   : > { %3551 = vst.msk [vmem:[%s5785_s29 + $0x18] sm:$0xf] %vm1820_vm5, %v3902_v11  ;;  %v3903_v23 = vpack.c.bf16 %v3502_v15, %v3502_v15  ;;  %v3476_v38 = vadd.f32 %v3466_v7, %v3322_v37  ;;  %v3323_v48 = vadd.f32 %v5763_v16, %v3306_v9 }
 0x47e   : > { %3552 = vst.msk [vmem:[%s5785_s29 + $0x1c] sm:$0xf] %vm1820_vm5, %v3903_v23  ;;  %v3493_v57 = vadd.f32 %v5772_v60, %v3476_v38  ;;  %v3477_v4 = vadd.f32 %v3467_v58, %v3323_v48 }
 0x480   : > { %v3503_v18 = vmax.f32 %v3493_v57, 0.0  ;;  %v3494_v19 = vadd.f32 %v5772_v60, %v3477_v4 }
 0x482   : > { %v3904_v33 = vpack.c.bf16 %v3503_v18, %v3503_v18  ;;  %v3504_v20 = vmax.f32 %v3494_v19, 0.0 }
 0x484   : > { %3553 = vst.msk [vmem:[%s5785_s29 + $0x20] sm:$0xf] %vm1820_vm5, %v3904_v33  ;;  %v3905_v3 = vpack.c.bf16 %v3504_v20, %v3504_v20 }
 0x486   : > { %3554 = vst.msk [vmem:[%s5785_s29 + $0x24] sm:$0xf] %vm1820_vm5, %v3905_v3 }
 0x487 PF: > { %s21_s17 = sadd.s32 1, %s4843_s17  }
 0x488   : > { %p18_p4 = scmp.ge.s32.totalorder %s21_s17, 4  }
 0x48a   :  { %20 = sbr.rel (!%p18_p4) target bundleno = 1 (0x1), region = 116 }

</bundles_post_ra>
